<compile_context>
chip_gen: v5e
topology: v5e:2x2
jax: 0.10.0
libtpu: 0.0.40
codegen_flags: <defaults>
</compile_context>

<pallas_src>
import math
import functools

import jax
import jax.numpy as jnp
from jax.experimental import pallas as pl
from jax.experimental.pallas import tpu as pltpu

# Full-f32 matmuls everywhere (kernel + pure-JAX reference) so the argmin
# comparison is deterministic; the kernel itself is overhead-bound at these
# sizes, not MXU-bound, so this costs nothing observable.
jax.config.update("jax_default_matmul_precision", "highest")


# ----------------------------------------------------------------------------
# Pallas kernel: one (batch-block nb, row-tile t) grid step.
#   x_ref    : (Bn, Cin, TM)   input activations (Bn packed samples)
#   w_ref    : (E, Cin)        1x1-conv projection weight (all groups)
#   b_ref    : (E, 1)          projection bias
#   eblk_ref : (G*K, E)        block-diagonal codebook  (row g*K+k = e[g,k] on cols [g*Dg,(g+1)*Dg))
#   eblkt_ref: (E, G*K)        its transpose
#   e2h_ref  : (G*K, 1)        -0.5 * ||e[g,k]||^2   (hoisted)
#   zq_ref   : (Bn, E, TM)     quantized output block (lane-dense stores)
#   cnt_ref  : (1, G*K, 1)     per-step code-usage partial counts
#   sse_ref  : (1, E, 1)       per-step per-row partial sum-squared-error
# ----------------------------------------------------------------------------
def _mkmvq_kernel(x_ref, w_ref, b_ref, eblk_ref, eblkt_ref, e2h_ref,
                  zq_ref, cnt_ref, sse_ref, *, num_groups, num_embed):
    G, K = num_groups, num_embed
    GK = G * K

    w = w_ref[...]           # (E, Cin)
    b = b_ref[...]           # (E, 1)
    eblk = eblk_ref[...]     # (GK, E)
    eblkt = eblkt_ref[...]   # (E, GK)
    e2h = e2h_ref[...]       # (GK, 1)

    Bn = x_ref.shape[0]
    E = w.shape[0]
    tm = x_ref.shape[-1]

    # Hoisted iota (JAX does not CSE broadcasts across loop iterations).
    iota = jax.lax.broadcasted_iota(jnp.int32, (K, tm), 0)

    cnt_acc = jnp.zeros((GK, 1), jnp.float32)
    sse_acc = jnp.zeros((E, 1), jnp.float32)

    for bi in range(Bn):                                   # static unroll
        x = x_ref[bi]                                      # (Cin, TM)

        # Fused 1x1-conv projection for all groups at once (one MXU matmul).
        xp = jax.lax.dot_general(
            w, x, (((1,), (0,)), ((), ())),
            preferred_element_type=jnp.float32) + b        # (E, TM)

        # Nearest-codeword score for every (group, codeword) row at once via
        # the block-diagonal codebook.  argmax_k (e.x - 0.5||e||^2) over a
        # group is argmin_k ||x_g - e_{g,k}||^2 (||x||^2 constant per column).
        score = jax.lax.dot_general(
            eblk, xp, (((1,), (0,)), ((), ())),
            preferred_element_type=jnp.float32) + e2h      # (GK, TM)

        # Per-group argmax with first-occurrence tie-break (== torch.argmin).
        # K is a multiple of 8 here, so the row slices are sublane-aligned.
        r_parts = []
        for g in range(G):
            sg = score[g * K:(g + 1) * K, :]               # (K, TM)
            smax = jnp.max(sg, axis=0, keepdims=True)      # (1, TM)
            cand = jnp.where(sg >= smax, iota, K)
            idx = jnp.min(cand, axis=0, keepdims=True)     # (1, TM)
            r_parts.append((iota == idx).astype(jnp.float32))
        r = jnp.concatenate(r_parts, axis=0) if G > 1 else r_parts[0]  # (GK, TM)

        # Selected codewords for all groups in one MXU matmul, written with a
        # single lane-dense (E, TM) store.
        zq = jax.lax.dot_general(
            eblkt, r, (((1,), (0,)), ((), ())),
            preferred_element_type=jnp.float32)            # (E, TM)
        zq_ref[bi] = zq

        cnt_acc = cnt_acc + jnp.sum(r, axis=1, keepdims=True)            # (GK, 1)
        diff = zq - xp
        sse_acc = sse_acc + jnp.sum(diff * diff, axis=1, keepdims=True)  # (E, 1)

    cnt_ref[0] = cnt_acc
    sse_ref[0] = sse_acc


def _pick_tile(hw, tile_m):
    """Largest 128-multiple <= tile_m that divides hw, or the full extent."""
    if hw <= tile_m:
        return hw
    t = (tile_m // 128) * 128
    while t >= 128:
        if hw % t == 0:
            return t
        t -= 128
    return hw


def _largest_divisor_le(n, cap):
    cap = max(1, min(n, cap))
    for d in range(cap, 0, -1):
        if n % d == 0:
            return d
    return 1


# ----------------------------------------------------------------------------
# Wrapper: multi-group K-means VQ forward (project=True, in_dim=4 -> Conv2d 1x1)
# ----------------------------------------------------------------------------
@functools.partial(jax.jit, static_argnames=("commitment_cost", "tile_m"))
def multi_kmeans_vq_forward(x, proj_w, proj_b, embed, commitment_cost=0.25,
                            tile_m=1024):
    """
    x:       (N, Cin, H, W)  float32   -- NCHW like the PyTorch module
    proj_w:  (E, Cin)        float32   -- Conv2d(in_feats, embed_feats, 1) weight
    proj_b:  (E,)            float32
    embed:   (G, K, Dg)      float32   -- per-group codebooks, E = G * Dg
    """
    N, Cin, H, W = x.shape
    G, K, Dg = embed.shape
    E = G * Dg
    GK = G * K
    assert proj_w.shape == (E, Cin)
    HW = H * W
    M = N * HW

    # Row tile along H*W (amortize per-grid-step overhead; lane-dense stores).
    tm = _pick_tile(HW, tile_m)
    n_hw = HW // tm
    # Pack batch samples per grid step when HW is small (>= ~2048 lanes/step).
    Bn = _largest_divisor_le(N, max(1, 2048 // tm))
    nb = N // Bn
    n_steps = nb * n_hw

    x3 = x.reshape(N, Cin, HW).astype(jnp.float32)        # free reshape of NCHW
    w = proj_w.astype(jnp.float32)                        # (E, Cin)
    b = proj_b.reshape(E, 1).astype(jnp.float32)          # (E, 1)
    e = embed.astype(jnp.float32)                         # (G, K, Dg)

    # Block-diagonal codebook: fuses the G per-group matmuls into single ones.
    eblk = jnp.zeros((GK, E), jnp.float32)
    for g in range(G):
        eblk = eblk.at[g * K:(g + 1) * K, g * Dg:(g + 1) * Dg].set(e[g])
    eblkt = eblk.T                                        # (E, GK)
    e2h = -0.5 * jnp.sum(e * e, axis=2).reshape(GK, 1)    # (GK, 1), hoisted

    kernel = functools.partial(_mkmvq_kernel, num_groups=G, num_embed=K)

    # Per-step VMEM footprint (double-buffered) is a few hundred KiB even at
    # the largest tiles used here -- far below v5e/v6e (128 MiB) and v7x
    # (64 MiB) limits, so no explicit vmem_limit is set.
    zq, counts, sse = pl.pallas_call(
        kernel,
        out_shape=(
            jax.ShapeDtypeStruct((N, E, HW), jnp.float32),
            jax.ShapeDtypeStruct((n_steps, GK, 1), jnp.float32),
            jax.ShapeDtypeStruct((n_steps, E, 1), jnp.float32),
        ),
        grid_spec=pltpu.PrefetchScalarGridSpec(
            num_scalar_prefetch=0,
            grid=(nb, n_hw),
            in_specs=[
                pl.BlockSpec((Bn, Cin, tm), lambda n, t: (n, 0, t)),
                pl.BlockSpec((E, Cin), lambda n, t: (0, 0)),
                pl.BlockSpec((E, 1), lambda n, t: (0, 0)),
                pl.BlockSpec((GK, E), lambda n, t: (0, 0)),
                pl.BlockSpec((E, GK), lambda n, t: (0, 0)),
                pl.BlockSpec((GK, 1), lambda n, t: (0, 0)),
            ],
            out_specs=[
                pl.BlockSpec((Bn, E, tm), lambda n, t: (n, 0, t)),
                # Per-(n, t) partials: no in-kernel accumulation, so both grid
                # axes can be "parallel" (v7x 2-TensorCore sharding).
                pl.BlockSpec((1, GK, 1), lambda n, t: (n * n_hw + t, 0, 0)),
                pl.BlockSpec((1, E, 1), lambda n, t: (n * n_hw + t, 0, 0)),
            ],
        ),
        compiler_params=pltpu.CompilerParams(
            dimension_semantics=("parallel", "parallel")),
    )(x3, w, b, eblk, eblkt, e2h)

    # ---- finalize (cheap glue in plain JAX) ----
    z_q = zq.reshape(N, E, H, W)                          # free reshape, NCHW

    counts_gk = jnp.sum(counts, axis=0).reshape(G, K)     # (G, K)
    sse_g = jnp.sum(sse, axis=0).reshape(G, Dg).sum(axis=1)   # (G,)

    # Per-group MSE; vq_loss and commitment_loss have identical forward value.
    mse_g = sse_g / (M * Dg)
    loss = jnp.sum(mse_g) * (1.0 + commitment_cost)

    probs = counts_gk / M                                 # (G, K)
    h_g = -jnp.sum(probs * jnp.log(probs + 1e-10), axis=1)
    log_perplexity = jnp.mean(h_g)

    kldiv_qrpr = G * math.log(K) * float(HW) * jnp.ones((N, 1), jnp.float32)

    # TODO(synk): straight-through estimator (inputs + (z_q - inputs).detach())
    # only affects gradients; the forward value equals z_q, which we return.
    return {"z_q": z_q, "loss": loss, "kldiv_qrpr": kldiv_qrpr,
            "log_perplexity": log_perplexity}


# ----------------------------------------------------------------------------
# Pure-JAX reference mirroring the PyTorch forward (sanity check).
# ----------------------------------------------------------------------------
def reference_forward(x, proj_w, proj_b, embed, cc=0.25):
    N, Cin, H, W = x.shape
    G, K, Dg = embed.shape
    xp = jnp.einsum("nchw,oc->nohw", x, proj_w) + proj_b[None, :, None, None]
    z_q_groups, loss, h_sum = [], 0.0, 0.0
    for g in range(G):
        xg = xp[:, g * Dg:(g + 1) * Dg]
        flat = jnp.transpose(xg, (0, 3, 2, 1)).reshape(-1, Dg)
        e = embed[g]
        d2 = (jnp.sum(flat ** 2, 1, keepdims=True) + jnp.sum(e ** 2, 1)
              - 2.0 * flat @ e.T)
        idx = jnp.argmin(d2, axis=1)
        r = jax.nn.one_hot(idx, K, dtype=jnp.float32)
        zq = r @ e
        mse = jnp.mean((zq - flat) ** 2)
        loss = loss + mse + cc * mse
        probs = jnp.mean(r, axis=0)
        h_sum = h_sum + (-jnp.sum(probs * jnp.log(probs + 1e-10)))
        z_q_groups.append(jnp.transpose(zq.reshape(N, W, H, Dg), (0, 3, 2, 1)))
    z_q = jnp.concatenate(z_q_groups, axis=1)
    M = N * H * W
    kldiv = G * math.log(K) * (M / N) * jnp.ones((N, 1), jnp.float32)
    return {"z_q": z_q, "loss": loss, "kldiv_qrpr": kldiv,
            "log_perplexity": h_sum / G}


def _check(out, ref, N, E, H, W):
    assert out["z_q"].shape == (N, E, H, W)
    assert out["kldiv_qrpr"].shape == (N, 1)
    assert jnp.allclose(out["z_q"], ref["z_q"], atol=1e-3, rtol=1e-3)
    assert jnp.allclose(out["loss"], ref["loss"], atol=1e-4, rtol=1e-3)
    assert jnp.allclose(out["log_perplexity"], ref["log_perplexity"],
                        atol=1e-4, rtol=1e-3)
    assert jnp.allclose(out["kldiv_qrpr"], ref["kldiv_qrpr"], rtol=1e-5, atol=1e-4)


if __name__ == "__main__":
    # Module config (matches MultiKMeansVectorQuantizer(__init__) shapes):
    #   num_groups=2, num_embed=16, embed_feats=32, project=True,
    #   in_feats=4, in_dim=4  ->  Conv2d(4, 32, kernel_size=1) projection.
    num_groups, num_embed, embed_feats = 2, 16, 32
    in_feats = 4
    dg = embed_feats // num_groups

    key = jax.random.PRNGKey(0)
    kx, kw, kb, ke, kx2 = jax.random.split(key, 5)
    proj_w = jax.random.normal(kw, (embed_feats, in_feats), jnp.float32) * 0.5
    proj_b = jax.random.normal(kb, (embed_feats,), jnp.float32) * 0.1
    embed = jax.random.normal(ke, (num_groups, num_embed, dg), jnp.float32)

    # Primary case: (2, 4, 16, 16) -> HW=256; both batch samples packed into a
    # single grid step (Bn=2, one row tile).
    N, H, W = 2, 16, 16
    x = jax.random.normal(kx, (N, in_feats, H, W), jnp.float32)
    out = multi_kmeans_vq_forward(x, proj_w, proj_b, embed, commitment_cost=0.25)
    jax.block_until_ready(out)
    _check(out, reference_forward(x, proj_w, proj_b, embed, cc=0.25),
           N, embed_feats, H, W)

    # Secondary case: (2, 4, 32, 32) -> HW=1024 with tile_m=512, exercising the
    # multi-row-tile grid and per-(n, t) partial reduction path.
    N2, H2, W2 = 2, 32, 32
    x2 = jax.random.normal(kx2, (N2, in_feats, H2, W2), jnp.float32)
    out2 = multi_kmeans_vq_forward(x2, proj_w, proj_b, embed,
                                   commitment_cost=0.25, tile_m=512)
    jax.block_until_ready(out2)
    _check(out2, reference_forward(x2, proj_w, proj_b, embed, cc=0.25),
           N2, embed_feats, H2, W2)

    print("KERNEL_OK")
</pallas_src>

<mosaic_0001>
module attributes {stable_mosaic.version = 11 : i64} {
  func.func @_mkmvq_kernel(%arg0: i32, %arg1: i32, %arg2: memref<2x4x256xf32, #tpu.memory_space<vmem>>, %arg3: memref<32x4xf32, #tpu.memory_space<vmem>>, %arg4: memref<32x1xf32, #tpu.memory_space<vmem>>, %arg5: memref<32x32xf32, #tpu.memory_space<vmem>>, %arg6: memref<32x32xf32, #tpu.memory_space<vmem>>, %arg7: memref<32x1xf32, #tpu.memory_space<vmem>>, %arg8: memref<2x32x256xf32, #tpu.memory_space<vmem>>, %arg9: memref<1x32x1xf32, #tpu.memory_space<vmem>>, %arg10: memref<1x32x1xf32, #tpu.memory_space<vmem>>) attributes {dimension_semantics = [#tpu.dimension_semantics<parallel>, #tpu.dimension_semantics<parallel>], iteration_bounds = array<i64: 1, 1>, scalar_prefetch = 0 : i64, scratch_operands = 0 : i64, tpu.core_type = #tpu.core_type<tc>, window_params = [{transform_indices = @transform_0, window_bounds = array<i64: 2, 4, 256>}, {pipeline_mode = #tpu.pipeline_mode<synchronous>, transform_indices = @transform_1, window_bounds = array<i64: 32, 4>}, {pipeline_mode = #tpu.pipeline_mode<synchronous>, transform_indices = @transform_2, window_bounds = array<i64: 32, 1>}, {pipeline_mode = #tpu.pipeline_mode<synchronous>, transform_indices = @transform_3, window_bounds = array<i64: 32, 32>}, {pipeline_mode = #tpu.pipeline_mode<synchronous>, transform_indices = @transform_4, window_bounds = array<i64: 32, 32>}, {pipeline_mode = #tpu.pipeline_mode<synchronous>, transform_indices = @transform_5, window_bounds = array<i64: 32, 1>}, {transform_indices = @transform_6, window_bounds = array<i64: 2, 32, 256>}, {transform_indices = @transform_7, window_bounds = array<i64: 1, 32, 1>}, {transform_indices = @transform_8, window_bounds = array<i64: 1, 32, 1>}]} {
    %c0 = arith.constant 0 : index
    %c0_0 = arith.constant 0 : index
    %0 = vector.load %arg3[%c0, %c0_0] : memref<32x4xf32, #tpu.memory_space<vmem>>, vector<32x4xf32>
    %c0_1 = arith.constant 0 : index
    %c0_2 = arith.constant 0 : index
    %1 = vector.load %arg4[%c0_1, %c0_2] : memref<32x1xf32, #tpu.memory_space<vmem>>, vector<32x1xf32>
    %c0_3 = arith.constant 0 : index
    %c0_4 = arith.constant 0 : index
    %2 = vector.load %arg5[%c0_3, %c0_4] : memref<32x32xf32, #tpu.memory_space<vmem>>, vector<32x32xf32>
    %c0_5 = arith.constant 0 : index
    %c0_6 = arith.constant 0 : index
    %3 = vector.load %arg6[%c0_5, %c0_6] : memref<32x32xf32, #tpu.memory_space<vmem>>, vector<32x32xf32>
    %c0_7 = arith.constant 0 : index
    %c0_8 = arith.constant 0 : index
    %4 = vector.load %arg7[%c0_7, %c0_8] : memref<32x1xf32, #tpu.memory_space<vmem>>, vector<32x1xf32>
    %5 = tpu.iota {dimensions = array<i32: 0>} : vector<16x256xi32>
    %cst = arith.constant 0.000000e+00 : f32
    %6 = vector.broadcast %cst : f32 to vector<32x1xf32>
    %cst_9 = arith.constant 0.000000e+00 : f32
    %7 = vector.broadcast %cst_9 : f32 to vector<32x1xf32>
    %c0_10 = arith.constant 0 : index
    %c0_11 = arith.constant 0 : index
    %c0_12 = arith.constant 0 : index
    %8 = vector.load %arg2[%c0_10, %c0_11, %c0_12] : memref<2x4x256xf32, #tpu.memory_space<vmem>>, vector<1x4x256xf32>
    %9 = vector.shape_cast %8 : vector<1x4x256xf32> to vector<4x256xf32>
    %cst_13 = arith.constant dense<0.000000e+00> : vector<32x256xf32>
    %10 = tpu.matmul %0, %9, %cst_13 {dimension_numbers = #tpu.dot_dimension_numbers<[1], [0], [0], [1], [0, 0, 1, 1], [], []>, precision = #tpu.contract_precision<fp32>} : vector<32x4xf32>, vector<4x256xf32>, vector<32x256xf32> -> vector<32x256xf32>
    %11 = vector.broadcast %1 : vector<32x1xf32> to vector<32x256xf32>
    %12 = arith.addf %10, %11 : vector<32x256xf32>
    %cst_14 = arith.constant dense<0.000000e+00> : vector<32x256xf32>
    %13 = tpu.matmul %2, %12, %cst_14 {dimension_numbers = #tpu.dot_dimension_numbers<[1], [0], [0], [1], [0, 0, 1, 1], [], []>, precision = #tpu.contract_precision<fp32>} : vector<32x32xf32>, vector<32x256xf32>, vector<32x256xf32> -> vector<32x256xf32>
    %14 = vector.broadcast %4 : vector<32x1xf32> to vector<32x256xf32>
    %15 = arith.addf %13, %14 : vector<32x256xf32>
    %16 = vector.extract_strided_slice %15 {offsets = [0, 0], sizes = [16, 256], strides = [1, 1]} : vector<32x256xf32> to vector<16x256xf32>
    %cst_15 = arith.constant dense<0xFF800000> : vector<256xf32>
    %17 = vector.multi_reduction <maximumf>, %16, %cst_15 [0] : vector<16x256xf32> to vector<256xf32>
    %18 = vector.shape_cast %17 : vector<256xf32> to vector<1x256xf32>
    %19 = vector.broadcast %18 : vector<1x256xf32> to vector<16x256xf32>
    %20 = arith.cmpf oge, %16, %19 : vector<16x256xf32>
    %c16_i32 = arith.constant 16 : i32
    %21 = vector.broadcast %c16_i32 : i32 to vector<16x256xi32>
    %22 = arith.select %20, %5, %21 : vector<16x256xi1>, vector<16x256xi32>
    %cst_16 = arith.constant dense<2147483647> : vector<256xi32>
    %23 = vector.multi_reduction <minsi>, %22, %cst_16 [0] : vector<16x256xi32> to vector<256xi32>
    %24 = vector.shape_cast %23 : vector<256xi32> to vector<1x256xi32>
    %25 = vector.broadcast %24 : vector<1x256xi32> to vector<16x256xi32>
    %26 = arith.cmpi eq, %5, %25 : vector<16x256xi32>
    %27 = arith.extui %26 : vector<16x256xi1> to vector<16x256xi32>
    %28 = arith.sitofp %27 : vector<16x256xi32> to vector<16x256xf32>
    %29 = vector.extract_strided_slice %15 {offsets = [16, 0], sizes = [16, 256], strides = [1, 1]} : vector<32x256xf32> to vector<16x256xf32>
    %cst_17 = arith.constant dense<0xFF800000> : vector<256xf32>
    %30 = vector.multi_reduction <maximumf>, %29, %cst_17 [0] : vector<16x256xf32> to vector<256xf32>
    %31 = vector.shape_cast %30 : vector<256xf32> to vector<1x256xf32>
    %32 = vector.broadcast %31 : vector<1x256xf32> to vector<16x256xf32>
    %33 = arith.cmpf oge, %29, %32 : vector<16x256xf32>
    %c16_i32_18 = arith.constant 16 : i32
    %34 = vector.broadcast %c16_i32_18 : i32 to vector<16x256xi32>
    %35 = arith.select %33, %5, %34 : vector<16x256xi1>, vector<16x256xi32>
    %cst_19 = arith.constant dense<2147483647> : vector<256xi32>
    %36 = vector.multi_reduction <minsi>, %35, %cst_19 [0] : vector<16x256xi32> to vector<256xi32>
    %37 = vector.shape_cast %36 : vector<256xi32> to vector<1x256xi32>
    %38 = vector.broadcast %37 : vector<1x256xi32> to vector<16x256xi32>
    %39 = arith.cmpi eq, %5, %38 : vector<16x256xi32>
    %40 = arith.extui %39 : vector<16x256xi1> to vector<16x256xi32>
    %41 = arith.sitofp %40 : vector<16x256xi32> to vector<16x256xf32>
    %42 = tpu.concatenate %28, %41 in 0 : vector<16x256xf32>, vector<16x256xf32> -> vector<32x256xf32>
    %cst_20 = arith.constant dense<0.000000e+00> : vector<32x256xf32>
    %43 = tpu.matmul %3, %42, %cst_20 {dimension_numbers = #tpu.dot_dimension_numbers<[1], [0], [0], [1], [0, 0, 1, 1], [], []>, precision = #tpu.contract_precision<fp32>} : vector<32x32xf32>, vector<32x256xf32>, vector<32x256xf32> -> vector<32x256xf32>
    %c0_21 = arith.constant 0 : index
    %c0_22 = arith.constant 0 : index
    %c0_23 = arith.constant 0 : index
    %44 = vector.load %arg8[%c0_21, %c0_22, %c0_23] : memref<2x32x256xf32, #tpu.memory_space<vmem>>, vector<1x32x256xf32>
    %45 = vector.shape_cast %44 : vector<1x32x256xf32> to vector<32x256xf32>
    %46 = vector.shape_cast %43 : vector<32x256xf32> to vector<1x32x256xf32>
    tpu.vector_store %arg8[%c0_21, %c0_22, %c0_23], %46 {strides = array<i32>} : memref<2x32x256xf32, #tpu.memory_space<vmem>>, vector<1x32x256xf32>,
    %cst_24 = arith.constant dense<0.000000e+00> : vector<32xf32>
    %47 = vector.multi_reduction <add>, %42, %cst_24 [1] : vector<32x256xf32> to vector<32xf32>
    %48 = vector.shape_cast %47 : vector<32xf32> to vector<32x1xf32>
    %49 = arith.addf %6, %48 : vector<32x1xf32>
    %50 = arith.subf %43, %12 : vector<32x256xf32>
    %51 = arith.mulf %50, %50 : vector<32x256xf32>
    %cst_25 = arith.constant dense<0.000000e+00> : vector<32xf32>
    %52 = vector.multi_reduction <add>, %51, %cst_25 [1] : vector<32x256xf32> to vector<32xf32>
    %53 = vector.shape_cast %52 : vector<32xf32> to vector<32x1xf32>
    %54 = arith.addf %7, %53 : vector<32x1xf32>
    %c1 = arith.constant 1 : index
    %c0_26 = arith.constant 0 : index
    %c0_27 = arith.constant 0 : index
    %55 = vector.load %arg2[%c1, %c0_26, %c0_27] : memref<2x4x256xf32, #tpu.memory_space<vmem>>, vector<1x4x256xf32>
    %56 = vector.shape_cast %55 : vector<1x4x256xf32> to vector<4x256xf32>
    %cst_28 = arith.constant dense<0.000000e+00> : vector<32x256xf32>
    %57 = tpu.matmul %0, %56, %cst_28 {dimension_numbers = #tpu.dot_dimension_numbers<[1], [0], [0], [1], [0, 0, 1, 1], [], []>, precision = #tpu.contract_precision<fp32>} : vector<32x4xf32>, vector<4x256xf32>, vector<32x256xf32> -> vector<32x256xf32>
    %58 = vector.broadcast %1 : vector<32x1xf32> to vector<32x256xf32>
    %59 = arith.addf %57, %58 : vector<32x256xf32>
    %cst_29 = arith.constant dense<0.000000e+00> : vector<32x256xf32>
    %60 = tpu.matmul %2, %59, %cst_29 {dimension_numbers = #tpu.dot_dimension_numbers<[1], [0], [0], [1], [0, 0, 1, 1], [], []>, precision = #tpu.contract_precision<fp32>} : vector<32x32xf32>, vector<32x256xf32>, vector<32x256xf32> -> vector<32x256xf32>
    %61 = vector.broadcast %4 : vector<32x1xf32> to vector<32x256xf32>
    %62 = arith.addf %60, %61 : vector<32x256xf32>
    %63 = vector.extract_strided_slice %62 {offsets = [0, 0], sizes = [16, 256], strides = [1, 1]} : vector<32x256xf32> to vector<16x256xf32>
    %cst_30 = arith.constant dense<0xFF800000> : vector<256xf32>
    %64 = vector.multi_reduction <maximumf>, %63, %cst_30 [0] : vector<16x256xf32> to vector<256xf32>
    %65 = vector.shape_cast %64 : vector<256xf32> to vector<1x256xf32>
    %66 = vector.broadcast %65 : vector<1x256xf32> to vector<16x256xf32>
    %67 = arith.cmpf oge, %63, %66 : vector<16x256xf32>
    %c16_i32_31 = arith.constant 16 : i32
    %68 = vector.broadcast %c16_i32_31 : i32 to vector<16x256xi32>
    %69 = arith.select %67, %5, %68 : vector<16x256xi1>, vector<16x256xi32>
    %cst_32 = arith.constant dense<2147483647> : vector<256xi32>
    %70 = vector.multi_reduction <minsi>, %69, %cst_32 [0] : vector<16x256xi32> to vector<256xi32>
    %71 = vector.shape_cast %70 : vector<256xi32> to vector<1x256xi32>
    %72 = vector.broadcast %71 : vector<1x256xi32> to vector<16x256xi32>
    %73 = arith.cmpi eq, %5, %72 : vector<16x256xi32>
    %74 = arith.extui %73 : vector<16x256xi1> to vector<16x256xi32>
    %75 = arith.sitofp %74 : vector<16x256xi32> to vector<16x256xf32>
    %76 = vector.extract_strided_slice %62 {offsets = [16, 0], sizes = [16, 256], strides = [1, 1]} : vector<32x256xf32> to vector<16x256xf32>
    %cst_33 = arith.constant dense<0xFF800000> : vector<256xf32>
    %77 = vector.multi_reduction <maximumf>, %76, %cst_33 [0] : vector<16x256xf32> to vector<256xf32>
    %78 = vector.shape_cast %77 : vector<256xf32> to vector<1x256xf32>
    %79 = vector.broadcast %78 : vector<1x256xf32> to vector<16x256xf32>
    %80 = arith.cmpf oge, %76, %79 : vector<16x256xf32>
    %c16_i32_34 = arith.constant 16 : i32
    %81 = vector.broadcast %c16_i32_34 : i32 to vector<16x256xi32>
    %82 = arith.select %80, %5, %81 : vector<16x256xi1>, vector<16x256xi32>
    %cst_35 = arith.constant dense<2147483647> : vector<256xi32>
    %83 = vector.multi_reduction <minsi>, %82, %cst_35 [0] : vector<16x256xi32> to vector<256xi32>
    %84 = vector.shape_cast %83 : vector<256xi32> to vector<1x256xi32>
    %85 = vector.broadcast %84 : vector<1x256xi32> to vector<16x256xi32>
    %86 = arith.cmpi eq, %5, %85 : vector<16x256xi32>
    %87 = arith.extui %86 : vector<16x256xi1> to vector<16x256xi32>
    %88 = arith.sitofp %87 : vector<16x256xi32> to vector<16x256xf32>
    %89 = tpu.concatenate %75, %88 in 0 : vector<16x256xf32>, vector<16x256xf32> -> vector<32x256xf32>
    %cst_36 = arith.constant dense<0.000000e+00> : vector<32x256xf32>
    %90 = tpu.matmul %3, %89, %cst_36 {dimension_numbers = #tpu.dot_dimension_numbers<[1], [0], [0], [1], [0, 0, 1, 1], [], []>, precision = #tpu.contract_precision<fp32>} : vector<32x32xf32>, vector<32x256xf32>, vector<32x256xf32> -> vector<32x256xf32>
    %c1_37 = arith.constant 1 : index
    %c0_38 = arith.constant 0 : index
    %c0_39 = arith.constant 0 : index
    %91 = vector.load %arg8[%c1_37, %c0_38, %c0_39] : memref<2x32x256xf32, #tpu.memory_space<vmem>>, vector<1x32x256xf32>
    %92 = vector.shape_cast %91 : vector<1x32x256xf32> to vector<32x256xf32>
    %93 = vector.shape_cast %90 : vector<32x256xf32> to vector<1x32x256xf32>
    tpu.vector_store %arg8[%c1_37, %c0_38, %c0_39], %93 {strides = array<i32>} : memref<2x32x256xf32, #tpu.memory_space<vmem>>, vector<1x32x256xf32>,
    %cst_40 = arith.constant dense<0.000000e+00> : vector<32xf32>
    %94 = vector.multi_reduction <add>, %89, %cst_40 [1] : vector<32x256xf32> to vector<32xf32>
    %95 = vector.shape_cast %94 : vector<32xf32> to vector<32x1xf32>
    %96 = arith.addf %49, %95 : vector<32x1xf32>
    %97 = arith.subf %90, %59 : vector<32x256xf32>
    %98 = arith.mulf %97, %97 : vector<32x256xf32>
    %cst_41 = arith.constant dense<0.000000e+00> : vector<32xf32>
    %99 = vector.multi_reduction <add>, %98, %cst_41 [1] : vector<32x256xf32> to vector<32xf32>
    %100 = vector.shape_cast %99 : vector<32xf32> to vector<32x1xf32>
    %101 = arith.addf %54, %100 : vector<32x1xf32>
    %c0_42 = arith.constant 0 : index
    %c0_43 = arith.constant 0 : index
    %c0_44 = arith.constant 0 : index
    %102 = vector.load %arg9[%c0_42, %c0_43, %c0_44] : memref<1x32x1xf32, #tpu.memory_space<vmem>>, vector<1x32x1xf32>
    %103 = vector.shape_cast %102 : vector<1x32x1xf32> to vector<32x1xf32>
    %104 = vector.shape_cast %96 : vector<32x1xf32> to vector<1x32x1xf32>
    tpu.vector_store %arg9[%c0_42, %c0_43, %c0_44], %104 {strides = array<i32>} : memref<1x32x1xf32, #tpu.memory_space<vmem>>, vector<1x32x1xf32>,
    %c0_45 = arith.constant 0 : index
    %c0_46 = arith.constant 0 : index
    %c0_47 = arith.constant 0 : index
    %105 = vector.load %arg10[%c0_45, %c0_46, %c0_47] : memref<1x32x1xf32, #tpu.memory_space<vmem>>, vector<1x32x1xf32>
    %106 = vector.shape_cast %105 : vector<1x32x1xf32> to vector<32x1xf32>
    %107 = vector.shape_cast %101 : vector<32x1xf32> to vector<1x32x1xf32>
    tpu.vector_store %arg10[%c0_45, %c0_46, %c0_47], %107 {strides = array<i32>} : memref<1x32x1xf32, #tpu.memory_space<vmem>>, vector<1x32x1xf32>,
    return
  }
  func.func @transform_0(%arg0: i32, %arg1: i32) -> (i32, i32, i32) {
    %c0_i32 = arith.constant 0 : i32
    %c0_i32_0 = arith.constant 0 : i32
    return %arg0, %c0_i32, %arg1 : i32, i32, i32
  }
  func.func @transform_1(%arg0: i32, %arg1: i32) -> (i32, i32) {
    %c0_i32 = arith.constant 0 : i32
    %c0_i32_0 = arith.constant 0 : i32
    %c0_i32_1 = arith.constant 0 : i32
    return %c0_i32, %c0_i32_0 : i32, i32
  }
  func.func @transform_2(%arg0: i32, %arg1: i32) -> (i32, i32) {
    %c0_i32 = arith.constant 0 : i32
    %c0_i32_0 = arith.constant 0 : i32
    %c0_i32_1 = arith.constant 0 : i32
    return %c0_i32, %c0_i32_0 : i32, i32
  }
  func.func @transform_3(%arg0: i32, %arg1: i32) -> (i32, i32) {
    %c0_i32 = arith.constant 0 : i32
    %c0_i32_0 = arith.constant 0 : i32
    %c0_i32_1 = arith.constant 0 : i32
    return %c0_i32, %c0_i32_0 : i32, i32
  }
  func.func @transform_4(%arg0: i32, %arg1: i32) -> (i32, i32) {
    %c0_i32 = arith.constant 0 : i32
    %c0_i32_0 = arith.constant 0 : i32
    %c0_i32_1 = arith.constant 0 : i32
    return %c0_i32, %c0_i32_0 : i32, i32
  }
  func.func @transform_5(%arg0: i32, %arg1: i32) -> (i32, i32) {
    %c0_i32 = arith.constant 0 : i32
    %c0_i32_0 = arith.constant 0 : i32
    %c0_i32_1 = arith.constant 0 : i32
    return %c0_i32, %c0_i32_0 : i32, i32
  }
  func.func @transform_6(%arg0: i32, %arg1: i32) -> (i32, i32, i32) {
    %c0_i32 = arith.constant 0 : i32
    %c0_i32_0 = arith.constant 0 : i32
    return %arg0, %c0_i32, %arg1 : i32, i32, i32
  }
  func.func @transform_7(%arg0: i32, %arg1: i32) -> (i32, i32, i32) {
    %c1_i32 = arith.constant 1 : i32
    %0 = arith.muli %arg0, %c1_i32 : i32
    %1 = arith.addi %0, %arg1 : i32
    %c0_i32 = arith.constant 0 : i32
    %c0_i32_0 = arith.constant 0 : i32
    %c0_i32_1 = arith.constant 0 : i32
    return %1, %c0_i32, %c0_i32_0 : i32, i32, i32
  }
  func.func @transform_8(%arg0: i32, %arg1: i32) -> (i32, i32, i32) {
    %c1_i32 = arith.constant 1 : i32
    %0 = arith.muli %arg0, %c1_i32 : i32
    %1 = arith.addi %0, %arg1 : i32
    %c0_i32 = arith.constant 0 : i32
    %c0_i32_0 = arith.constant 0 : i32
    %c0_i32_1 = arith.constant 0 : i32
    return %1, %c0_i32, %c0_i32_0 : i32, i32, i32
  }
}

</mosaic_0001>

<bundles_post_ra>
// kernel: multi_kmeans_vq_forward.1
= control target key start
LH: loop header
LB: loop body
LE: loop exit
PB: predicated region body
PF: predicated region fallthrough
CT: control target
= control target key end

     0   :  { %vm100_vm0 = vcmask 31744   ;;  %v3832_v2 = vmov 0   ;;  %vm113_vm1 = vcmask 1043456   ;;  %vm616_vm2 = vcmask 261120   ;;  %s5104_s0 = inlined_call_operand.vmem [shape: f32[2,4,256], index: 0, kind: input, shape index: {}]   ;;  %s5105_s1 = inlined_call_operand.vmem [shape: f32[32,4], index: 1, kind: input, shape index: {}]   ;;  %s5106_s2 = inlined_call_operand.vmem [shape: f32[32,1], index: 2, kind: input, shape index: {}]   ;;  %s5107_s5 = inlined_call_operand.vmem [shape: f32[32,1], index: 5, kind: input, shape index: {}]   ;;  %s5108_s3 = inlined_call_operand.vmem [shape: f32[32,32], index: 3, kind: input, shape index: {}]   ;;  %s5109_s4 = inlined_call_operand.vmem [shape: f32[32,32], index: 4, kind: input, shape index: {}]   ;;  %s5110_s6 = inlined_call_operand.vmem [shape: f32[2,32,256], index: 6, kind: output, shape index: {0}]   ;;  %s5111_s7 = inlined_call_operand.vmem [shape: f32[1,32,1], index: 7, kind: output, shape index: {1}]   ;;  %s5112_s8 = inlined_call_operand.vmem [shape: f32[1,32,1], index: 8, kind: output, shape index: {2}]  }
   0x1   :  { %v75_v0 = vld [vmem:[%s5104_s0] sm:$0xff]  ;;  %3830 = vset.pattern.permute.xlu1 %v3832_v2  ;;  %v53_v3 = vld [vmem:[%s5105_s1 + $0x8] sm:$0xff]  ;;  %3829 = vset.pattern.permute.xlu0 %v3832_v2  ;;  %v54_v9 = vld [vmem:[%s5105_s1 + $0x10] sm:$0xff] }
   0x2   :  { %v52_v1 = vld [vmem:[%s5105_s1] sm:$0xff]  ;;  %97 = vst [vmem:[#allocation1] ss:$2 sm:$0xff] %v75_v0  ;;  %v105_v5 = vsel %vm100_vm0, %v53_v3, 0  ;;  %v57_v6 = vld [vmem:[%s5106_s2 + $0x8] sm:$0xff]  ;;  %3831 = vset.pattern.permute.xlu2 %v3832_v2  ;;  %v59_v12 = vld [vmem:[%s5106_s2 + $0x18] sm:$0xff] }
   0x3   :  { %v102_v4 = vsel %vm100_vm0, %v52_v1, 0  ;;  %v3896_v8 = vand.u32 4294901760, %v105_v5  ;;  %83 = vperm.xlu1 %3830, %v57_v6   ;;  %v108_v14 = vsel %vm100_vm0, %v54_v9, 0  ;;  %93 = vperm.xlu0 %3829, %v59_v12   ;;  %v56_v15 = vld [vmem:[%s5106_s2] sm:$0xff]  ;;  %v3785_v16 = vld [vmem:[%s5104_s0 + $0x8] sm:$0xff]  ;;  %v55_v25 = vld [vmem:[%s5105_s1 + $0x18] sm:$0xff] }
   0x4   :  { %v3894_v7 = vand.u32 4294901760, %v102_v4  ;;  %v3926_v21 = vand.u32 4294901760, %v108_v14  ;;  %v58_v31 = vld [vmem:[%s5106_s2 + $0x10] sm:$0xff]  ;;  %v111_v33 = vsel %vm100_vm0, %v55_v25, 0  ;;  %v68_v49 = vld [vmem:[%s5107_s5] sm:$0xff]  ;;  %v69_v50 = vld [vmem:[%s5107_s5 + $0x8] sm:$0xff] }
   0x5   :  { %v3905_v11 = vsub.f32 %v105_v5, %v3896_v8  ;;  %v3951_v39 = vand.u32 4294901760, %v111_v33 }
   0x6   :  { %v3902_v10 = vsub.f32 %v102_v4, %v3894_v7  ;;  %v3939_v30 = vsub.f32 %v108_v14, %v3926_v21 }
   0x7   :  { %v3924_v20 = vand.u32 4294901760, %v3905_v11  ;;  %v3958_v44 = vsub.f32 %v111_v33, %v3951_v39  ;;  %v60_v33 = vld [vmem:[%s5108_s3] sm:$0xff] }
   0x8   :  { %v3911_v13 = vand.u32 4294901760, %v3902_v10  ;;  %v3949_v38 = vand.u32 4294901760, %v3939_v30 }
   0x9   :  { %v98_v17 = vld.sshfl [vmem:[#allocation1] sm:$0xff pattern:$0x75316420]  ;;  %v99_v22 = vld.sshfl [vmem:[#allocation1 + $0x8] sm:$0xff pattern:$0x75316420]  ;;  %v146_v29 = vsub.f32 %v3905_v11, %v3924_v20 }
   0xa   :  { %v138_v18 = vsub.f32 %v3902_v10, %v3911_v13  ;;  %v114_v19 = vsel %vm113_vm1, %v98_v17, 0  ;;  %1924 = vst [vmem:[#allocation1] ss:$2 sm:$0xff] %v3785_v16  ;;  %v116_v26 = vsel %vm113_vm1, %v99_v22, 0  ;;  %v154_v43 = vsub.f32 %v3939_v30, %v3949_v38 }
   0xb   :  { %v133_v23 = vand.u32 4294901760, %v114_v19  ;;  %78 = vperm.xlu1 %3830, %v56_v15   ;;  %v372_v28 = vand.u32 4294901760, %v116_v26  ;;  %88 = vperm.xlu0 %3829, %v58_v31   ;;  %v3946_v37 = vand.u32 4294901760, %v146_v29  ;;  %v3965_v46 = vand.u32 4294901760, %v3958_v44 }
   0xc   :  { %v3928_v24 = vand.u32 4294901760, %v138_v18  ;;  %v3962_v45 = vand.u32 4294901760, %v154_v43 }
   0xd   :  { %134 = vmatpush.msra.mxu0 %v133_v23  ;;  %v184_v27 = vsub.f32 %v114_v19, %v133_v23  ;;  %261 = vmatpush.msra.mxu3 %v133_v23  ;;  %v423_v34 = vsub.f32 %v116_v26, %v372_v28  ;;  %v162_v47 = vsub.f32 %v3958_v44, %v3965_v46 }
   0xe   :  { %140 = vmatmul.f32.vlgmr.msra.gmra.mxu0 %v3928_v24  ;;  %265 = vmatmul.f32.vlgmr.msra.gmra.mxu3 %v3911_v13 }
   0xf   :  { %223 = vmatpush.msra.mxu2 %v184_v27  ;;  %v185_v32 = vand.u32 4294901760, %v184_v27  ;;  %v424_v36 = vand.u32 4294901760, %v423_v34  ;;  %v3973_v48 = vand.u32 4294901760, %v162_v47 }
  0x10   :  { %226 = vmatmul.f32.vlgmr.msra.gmra.mxu2 %v3902_v10 }
  0x11   :  { %v186_v35 = vsub.f32 %v184_v27, %v185_v32  ;;  %373 = vmatpush.msrb.mxu2 %v372_v28  ;;  %305 = vmatpush.msrb.mxu0 %v185_v32  ;;  %v425_v41 = vsub.f32 %v423_v34, %v424_v36 }
  0x13   :  { %462 = vmatpush.msra.mxu0 %v423_v34  ;;  %v187_v40 = vand.u32 4294901760, %v186_v35  ;;  %544 = vmatpush.msra.mxu2 %v424_v36  ;;  %v426_v42 = vand.u32 4294901760, %v425_v41  ;;  %v618_v41 = vsel %vm616_vm2, %v60_v33, 0 }
  0x14   :  { %598 = vperm.xlu0 %3829, %v68_v49   ;;  %603 = vperm.xlu1 %3830, %v69_v50  }
  0x15   :  { %188 = vmatpush.msra.mxu1 %v187_v40  ;;  %427 = vmatpush.msrb.mxu3 %v426_v42 }
  0x16   :  { %148 = vmatmul.f32.gmra.mxu0 %v3946_v37  ;;  %190 = vmatmul.f32.vlgmr.msra.gmra.mxu1 %v3894_v7 }
  0x17   :  { %271 = vmatmul.f32.gmra.mxu3 %v3924_v20  ;;  %339 = vmatpush.msrb.mxu1 %v133_v23 }
  0x18   :  { %231 = vmatmul.f32.gmra.mxu2 %v3905_v11  ;;  %578 = vmatpush.msra.mxu3 %v372_v28 }
  0x19   :  { %500 = vmatpush.msra.mxu1 %v372_v28 }
  0x1e   :  { %156 = vmatmul.f32.gmra.mxu0 %v3962_v45  ;;  %194 = vmatmul.f32.gmra.mxu1 %v3896_v8 }
  0x1f   :  { %277 = vmatmul.f32.gmra.mxu3 %v3949_v38 }
  0x20   :  { %236 = vmatmul.f32.gmra.mxu2 %v3939_v30 }
  0x26   :  { %164 = vmatmul.f32.gmra.mxu0 %v3973_v48  ;;  %198 = vmatmul.f32.gmra.mxu1 %v3926_v21 }
  0x27   :  { %283 = vmatmul.f32.gmra.mxu3 %v3965_v46 }
  0x28   :  { %241 = vmatmul.f32.gmra.mxu2 %v3958_v44 }
  0x2e   :  { %202 = vmatmul.f32.gmra.mxu1 %v3951_v39  ;;  %307 = vmatmul.f32.vlgmr.msrb.gmra.mxu0 %v3894_v7 }
  0x2f   :  { %429 = vmatmul.f32.vlgmr.msrb.gmra.mxu3 %v3894_v7 }
  0x30   :  { %379 = vmatmul.f32.vlgmr.msrb.gmra.mxu2 %v3928_v24 }
  0x36   :  { %311 = vmatmul.f32.gmra.mxu0 %v3896_v8  ;;  %341 = vmatmul.f32.vlgmr.msrb.gmra.mxu1 %v3894_v7 }
  0x37   :  { %433 = vmatmul.f32.gmra.mxu3 %v3896_v8 }
  0x38   :  { %387 = vmatmul.f32.gmra.mxu2 %v3946_v37 }
  0x3e   :  { %315 = vmatmul.f32.gmra.mxu0 %v3926_v21  ;;  %345 = vmatmul.f32.gmra.mxu1 %v3896_v8 }
  0x3f   :  { %437 = vmatmul.f32.gmra.mxu3 %v3926_v21 }
  0x40   :  { %395 = vmatmul.f32.gmra.mxu2 %v3962_v45 }
  0x46   :  { %319 = vmatmul.f32.gmra.mxu0 %v3951_v39  ;;  %349 = vmatmul.f32.gmra.mxu1 %v3926_v21 }
  0x47   :  { %441 = vmatmul.f32.gmra.mxu3 %v3951_v39 }
  0x48   :  { %403 = vmatmul.f32.gmra.mxu2 %v3973_v48 }
  0x4e   :  { %353 = vmatmul.f32.gmra.mxu1 %v3951_v39  ;;  %465 = vmatmul.f32.vlgmr.msra.gmra.mxu0 %v3902_v10 }
  0x4f   :  { %580 = vmatmul.f32.vlgmr.msra.gmra.mxu3 %v3894_v7 }
  0x50   :  { %546 = vmatmul.f32.vlgmr.msra.gmra.mxu2 %v3894_v7 }
  0x56   :  { %470 = vmatmul.f32.gmra.mxu0 %v3905_v11  ;;  %504 = vmatmul.f32.vlgmr.msra.gmra.mxu1 %v3911_v13 }
  0x57   :  { %584 = vmatmul.f32.gmra.mxu3 %v3896_v8 }
  0x58   :  { %550 = vmatmul.f32.gmra.mxu2 %v3896_v8 }
  0x5e   :  { %475 = vmatmul.f32.gmra.mxu0 %v3939_v30  ;;  %510 = vmatmul.f32.gmra.mxu1 %v3924_v20 }
  0x5f   :  { %588 = vmatmul.f32.gmra.mxu3 %v3926_v21 }
  0x60   :  { %554 = vmatmul.f32.gmra.mxu2 %v3926_v21 }
  0x66   :  { %480 = vmatmul.f32.gmra.mxu0 %v3958_v44  ;;  %516 = vmatmul.f32.gmra.mxu1 %v3949_v38 }
  0x67   :  { %592 = vmatmul.f32.gmra.mxu3 %v3951_v39 }
  0x68   :  { %558 = vmatmul.f32.gmra.mxu2 %v3951_v39 }
  0x6e   :  { %522 = vmatmul.f32.gmra.mxu1 %v3965_v46 }
  0x75   :  { %v4018_v0 = vpop.permute.xlu0 %93  ;;  %v4020_v1 = vpop.permute.xlu1 %83 }
  0x76   :  { %5169 = vst [vmem:[#allocation2_spill] sm:$0xff] %v4018_v0 }
  0x7d   :  { %v4022_v6 = vpop.permute.xlu0 %88  ;;  %v4029_v17 = vpop.permute.xlu1 %78 }
  0x8b   :  { %v141_v51 = vpop.f32.mrf.mxu0 }
  0x8c   :  { %v142_v19 = vadd.f32 %v141_v51, %v4029_v17  ;;  %v4044_v51 = vand.u32 4294901760, %v618_v41 }
  0x8e   :  { %5170 = vst [vmem:[#allocation3_spill] sm:$0xff] %v4044_v51 }
  0x91   :  { %v266_v52 = vpop.f32.mrf.mxu3 }
  0x93   :  { %v149_v53 = vpop.f32.mrf.mxu0  ;;  %v191_v54 = vpop.f32.mrf.mxu1 }
  0x94   :  { %v227_v55 = vpop.f32.mrf.mxu2  ;;  %v150_v18 = vadd.f32 %v149_v53, %v4020_v1  ;;  %v192_v28 = vadd.f32 %v191_v54, %v142_v19 }
  0x96   :  { %v228_v35 = vadd.f32 %v227_v55, %v192_v28  ;;  %v61_v55 = vld [vmem:[%s5108_s3 + $0x8] sm:$0xff] }
  0x98   :  { %v267_v53 = vadd.f32 %v266_v52, %v228_v35 }
  0x9a   :  { %v272_v56 = vpop.f32.mrf.mxu3 }
  0x9b   :  { %v157_v57 = vpop.f32.mrf.mxu0  ;;  %v195_v58 = vpop.f32.mrf.mxu1 }
  0x9c   :  { %v232_v59 = vpop.f32.mrf.mxu2  ;;  %v158_v15 = vadd.f32 %v157_v57, %v4022_v6  ;;  %v196_v23 = vadd.f32 %v195_v58, %v150_v18 }
  0x9e   :  { %v233_v34 = vadd.f32 %v232_v59, %v196_v23 }
  0xa0   :  { %v273_v42 = vadd.f32 %v272_v56, %v233_v34 }
  0xa2   :  { %v278_v60 = vpop.f32.mrf.mxu3 }
  0xa3   :  { %v165_v61 = vpop.f32.mrf.mxu0  ;;  %v199_v62 = vpop.f32.mrf.mxu1 }
  0xa4   :  { %v237_v63 = vpop.f32.mrf.mxu2  ;;  %v200_v22 = vadd.f32 %v199_v62, %v158_v15  ;;  %v166_v29 = vadd.f32 %v165_v61, %v4018_v0 }
  0xa6   :  { %v238_v31 = vadd.f32 %v237_v63, %v200_v22 }
  0xa8   :  { %v279_v36 = vadd.f32 %v278_v60, %v238_v31  ;;  %v4056_v60 = vsub.f32 %v618_v41, %v4044_v51 }
  0xaa   :  { %v284_v2 = vpop.f32.mrf.mxu3  ;;  %5173 = vst [vmem:[#allocation6_spill] sm:$0xff] %v4056_v60  ;;  %v4072_v19 = vand.u32 4294901760, %v4056_v60 }
  0xab   :  { %v203_v3 = vpop.f32.mrf.mxu1  ;;  %v308_v4 = vpop.f32.mrf.mxu0 }
  0xac   :  { %v242_v5 = vpop.f32.mrf.mxu2  ;;  %v204_v40 = vadd.f32 %v203_v3, %v166_v29  ;;  %v309_v59 = vadd.f32 %v308_v4, %v267_v53  ;;  %v621_v3 = vsel %vm616_vm2, %v61_v55, 0  ;;  %5175 = vst [vmem:[#allocation8_spill] sm:$0xff] %v4072_v19  ;;  %v652_v31 = vsub.f32 %v4056_v60, %v4072_v19 }
  0xae   :  { %v243_v54 = vadd.f32 %v242_v5, %v204_v40  ;;  %v4111_v53 = vand.u32 4294901760, %v652_v31 }
  0xb0   :  { %v285_v62 = vadd.f32 %v284_v2, %v243_v54  ;;  %v4074_v2 = vand.u32 4294901760, %v621_v3  ;;  %5179 = vst [vmem:[#allocation12_spill] sm:$0xff] %v4111_v53 }
  0xb2   :  { %v4024_v9 = vpop.f32.mrf.mxu3  ;;  %5176 = vst [vmem:[#allocation9_spill] sm:$0xff] %v4074_v2  ;;  %v4096_v33 = vsub.f32 %v621_v3, %v4074_v2 }
  0xb3   :  { %v312_v12 = vpop.f32.mrf.mxu0  ;;  %v342_v14 = vpop.f32.mrf.mxu1 }
  0xb4   :  { %v4027_v16 = vpop.f32.mrf.mxu2  ;;  %v313_v57 = vadd.f32 %v312_v12, %v273_v42  ;;  %v4058_v63 = vadd.f32 %v342_v14, %v309_v59  ;;  %5178 = vst [vmem:[#allocation11_spill] sm:$0xff] %v4096_v33  ;;  %v4114_v54 = vand.u32 4294901760, %v4096_v33 }
  0xb6   :  { %5174 = vst [vmem:[#allocation7_spill] sm:$0xff] %v4058_v63  ;;  %v4077_v14 = vand.u32 4294901760, %v4058_v63  ;;  %v660_v31 = vsub.f32 %v4096_v33, %v4114_v54 }
  0xb7   :  { %5180 = vst [vmem:[#allocation13_spill] sm:$0xff] %v4114_v54 }
  0xb8   :  { %v713_v35 = vsub.f32 %v4058_v63, %v4077_v14 }
  0xba   :  { %v4033_v25 = vpop.f32.mrf.mxu3  ;;  %v714_v3 = vand.u32 4294901760, %v713_v35 }
  0xbb   :  { %v316_v26 = vpop.f32.mrf.mxu0  ;;  %v346_v27 = vpop.f32.mrf.mxu1 }
  0xbc   :  { %v4036_v32 = vpop.f32.mrf.mxu2  ;;  %v317_v43 = vadd.f32 %v316_v26, %v279_v36  ;;  %v4053_v56 = vadd.f32 %v346_v27, %v313_v57  ;;  %v62_v27 = vld [vmem:[%s5108_s3 + $0x10] sm:$0xff] }
  0xbd   :  { %v624_v40 = vsel %vm616_vm2, %v62_v27, 0 }
  0xbe   :  { %5172 = vst [vmem:[#allocation5_spill] sm:$0xff] %v4053_v56  ;;  %v4065_v5 = vand.u32 4294901760, %v4053_v56  ;;  %v4116_v57 = vand.u32 4294901760, %v624_v40 }
  0xc0   :  { %v707_v29 = vsub.f32 %v4053_v56, %v4065_v5  ;;  %5181 = vst [vmem:[#allocation14_spill] sm:$0xff] %v4116_v57 }
  0xc2   :  { %v4042_v47 = vpop.f32.mrf.mxu3 }
  0xc3   :  { %v320_v49 = vpop.f32.mrf.mxu0  ;;  %v350_v50 = vpop.f32.mrf.mxu1 }
  0xc4   :  { %v4046_v58 = vadd.f32 %v350_v50, %v317_v43  ;;  %v4048_v61 = vpop.f32.mrf.mxu2  ;;  %v321_v12 = vadd.f32 %v320_v49, %v285_v62  ;;  %v708_v43 = vand.u32 4294901760, %v707_v29 }
  0xc6   :  { %5171 = vst [vmem:[#allocation4_spill] sm:$0xff] %v4046_v58  ;;  %v4061_v52 = vand.u32 4294901760, %v4046_v58  ;;  %v709_v27 = vsub.f32 %v707_v29, %v708_v43 }
  0xc8   :  { %v701_v26 = vsub.f32 %v4046_v58, %v4061_v52 }
  0xca   :  { %v4067_v15 = vpop.f32.mrf.mxu3  ;;  %v702_v36 = vand.u32 4294901760, %v701_v26 }
  0xcb   :  { %v354_v4 = vpop.f32.mrf.mxu1  ;;  %v4069_v18 = vpop.f32.mrf.mxu0 }
  0xcc   :  { %v4079_v22 = vadd.f32 %v354_v4, %v321_v12  ;;  %v4081_v23 = vpop.f32.mrf.mxu2  ;;  %v703_v62 = vsub.f32 %v701_v26, %v702_v36  ;;  %v63_v12 = vld [vmem:[%s5108_s3 + $0x18] sm:$0xff] }
  0xcd   :  { %v627_v58 = vsel %vm616_vm2, %v63_v12, 0 }
  0xce   :  { %5177 = vst [vmem:[#allocation10_spill] sm:$0xff] %v4079_v22  ;;  %v4089_v28 = vand.u32 4294901760, %v4079_v22 }
  0xd0   :  { %v695_v34 = vsub.f32 %v4079_v22, %v4089_v28  ;;  %642 = vmatpush.msrb.mxu0 %v4089_v28  ;;  %793 = vmatpush.msrb.mxu3 %v4089_v28  ;;  %v715_v22 = vsub.f32 %v713_v35, %v714_v3 }
  0xd2   :  { %644 = vmatpush.msrb.mxu0 %v4061_v52  ;;  %749 = vmatpush.msrb.mxu2 %v695_v34  ;;  %v4106_v41 = vpop.f32.mrf.mxu3  ;;  %v696_v42 = vand.u32 4294901760, %v695_v34  ;;  %v716_v12 = vand.u32 4294901760, %v715_v22 }
  0xd3   :  { %795 = vmatpush.msrb.mxu3 %v4061_v52  ;;  %v471_v49 = vpop.f32.mrf.mxu0  ;;  %v4109_v50 = vpop.f32.mrf.mxu1 }
  0xd4   :  { %646 = vmatpush.msrb.mxu0 %v4065_v5  ;;  %752 = vmatpush.msrb.mxu2 %v701_v26  ;;  %v4119_v55 = vpop.f32.mrf.mxu2  ;;  %v697_v59 = vsub.f32 %v695_v34, %v696_v42  ;;  %v4131_v26 = vsub.f32 %v624_v40, %v4116_v57  ;;  %v704_v34 = vand.u32 4294901760, %v703_v62  ;;  %v4138_v40 = vand.u32 4294901760, %v660_v31 }
  0xd5   :  { %797 = vmatpush.msrb.mxu3 %v4065_v5  ;;  %v4143_v62 = vand.u32 4294901760, %v627_v58 }
  0xd6   :  { %648 = vmatpush.msrb.mxu0 %v4077_v14  ;;  %755 = vmatpush.msrb.mxu2 %v707_v29  ;;  %v698_v4 = vand.u32 4294901760, %v697_v59  ;;  %5182 = vst [vmem:[#allocation15_spill] sm:$0xff] %v4131_v26  ;;  %v389_v29 = vadd.f32 %v4036_v32, %v4020_v1  ;;  %v710_v59 = vand.u32 4294901760, %v709_v27  ;;  %v397_v32 = vadd.f32 %v4048_v61, %v4022_v6 }
  0xd7   :  { %799 = vmatpush.msrb.mxu3 %v4077_v14  ;;  %654 = vmatmul.f32.vlgmr.msrb.gmra.mxu0 %v4111_v53  ;;  %5183 = vst [vmem:[#allocation16_spill] sm:$0xff] %v4138_v40 }
  0xd8   :  { %840 = vmatpush.msra.mxu0 %v696_v42  ;;  %699 = vmatpush.msrb.mxu1 %v698_v4  ;;  %v4141_v42 = vand.u32 4294901760, %v4131_v26  ;;  %5185 = vst [vmem:[#allocation18_spill] sm:$0xff] %v4143_v62  ;;  %v435_v27 = vadd.f32 %v4033_v25, %v389_v29 }
  0xd9   :  { %758 = vmatpush.msrb.mxu2 %v713_v35  ;;  %803 = vmatmul.f32.vlgmr.msrb.gmra.mxu3 %v4072_v19  ;;  %v381_v35 = vadd.f32 %v4027_v16, %v4029_v17  ;;  %v4155_v16 = vsub.f32 %v627_v58, %v4143_v62 }
  0xda   :  { %844 = vmatpush.msra.mxu0 %v702_v36  ;;  %705 = vmatpush.msrb.mxu1 %v704_v34  ;;  %v585_v56 = vpop.f32.mrf.mxu3  ;;  %5184 = vst [vmem:[#allocation17_spill] sm:$0xff] %v4141_v42  ;;  %v668_v31 = vsub.f32 %v4131_v26, %v4141_v42  ;;  %v472_v22 = vadd.f32 %v471_v49, %v435_v27 }
  0xdb   :  { %v511_v63 = vpop.f32.mrf.mxu1  ;;  %761 = vmatmul.f32.vlgmr.msrb.gmra.mxu2 %v4056_v60  ;;  %v476_v4 = vpop.f32.mrf.mxu0  ;;  %5186 = vst [vmem:[#allocation19_spill] sm:$0xff] %v4155_v16  ;;  %v431_v61 = vadd.f32 %v4024_v9, %v381_v35  ;;  %v4167_v9 = vand.u32 4294901760, %v4155_v16 }
  0xdc   :  { %848 = vmatpush.msra.mxu0 %v708_v43  ;;  %711 = vmatpush.msrb.mxu1 %v710_v59  ;;  %v551_v36 = vpop.f32.mrf.mxu2  ;;  %v439_v43 = vadd.f32 %v4042_v47, %v397_v32  ;;  %v512_v34 = vadd.f32 %v511_v63, %v472_v22  ;;  %v4164_v59 = vand.u32 4294901760, %v668_v31  ;;  %v405_v47 = vadd.f32 %v4081_v23, %v4018_v0 }
  0xdd   :  { %v467_v25 = vadd.f32 %v4069_v18, %v431_v61  ;;  %5188 = vst [vmem:[#allocation21_spill] sm:$0xff] %v4167_v9  ;;  %v676_v32 = vsub.f32 %v4155_v16, %v4167_v9 }
  0xde   :  { %852 = vmatpush.msra.mxu0 %v714_v3  ;;  %717 = vmatpush.msrb.mxu1 %v716_v12  ;;  %v477_v3 = vadd.f32 %v476_v4, %v439_v43  ;;  %5187 = vst [vmem:[#allocation20_spill] sm:$0xff] %v4164_v59  ;;  %v552_v18 = vadd.f32 %v551_v36, %v512_v34 }
  0xdf   :  { %662 = vmatmul.f32.gmra.mxu0 %v4138_v40  ;;  %719 = vmatmul.f32.vlgmr.msrb.gmra.mxu1 %v4044_v51  ;;  %v443_v23 = vadd.f32 %v4067_v15, %v405_v47  ;;  %v4186_v4 = vand.u32 4294901760, %v676_v32 }
  0xe0   :  { %883 = vmatpush.msra.mxu1 %v4089_v28  ;;  %v506_v28 = vadd.f32 %v4109_v50, %v467_v25 }
  0xe1   :  { %809 = vmatmul.f32.gmra.mxu3 %v4114_v54  ;;  %5189 = vst [vmem:[#allocation22_spill] sm:$0xff] %v4186_v4 }
  0xe2   :  { %885 = vmatpush.msra.mxu1 %v4061_v52  ;;  %v589_v58 = vpop.f32.mrf.mxu3  ;;  %v548_v50 = vadd.f32 %v4119_v55, %v506_v28  ;;  %v70_v28 = vld [vmem:[%s5107_s5 + $0x10] sm:$0xff] }
  0xe3   :  { %v517_v29 = vpop.f32.mrf.mxu1  ;;  %766 = vmatmul.f32.gmra.mxu2 %v4096_v33  ;;  %v481_v35 = vpop.f32.mrf.mxu0  ;;  %608 = vperm.xlu2 %3831, %v70_v28  }
  0xe4   :  { %v518_v49 = vadd.f32 %v517_v29, %v477_v3  ;;  %887 = vmatpush.msra.mxu1 %v4065_v5  ;;  %v555_v63 = vpop.f32.mrf.mxu2  ;;  %v4183_v5 = vadd.f32 %v585_v56, %v552_v18  ;;  %v482_v36 = vadd.f32 %v481_v35, %v443_v23  ;;  %v4189_v27 = vadd.f32 %v4106_v41, %v548_v50 }
  0xe6   :  { %v556_v52 = vadd.f32 %v555_v63, %v518_v49  ;;  %889 = vmatpush.msra.mxu1 %v4077_v14  ;;  %v923_v43 = vand.u32 4294901760, %v4183_v5  ;;  %v925_v56 = vand.u32 4294901760, %v4189_v27 }
  0xe7   :  { %670 = vmatmul.f32.gmra.mxu0 %v4164_v59  ;;  %723 = vmatmul.f32.gmra.mxu1 %v4074_v2 }
  0xe8   :  { %v4180_v12 = vadd.f32 %v589_v58, %v556_v52  ;;  %v985_v34 = vsub.f32 %v4183_v5, %v923_v43  ;;  %v991_v58 = vsub.f32 %v4189_v27, %v925_v56 }
  0xe9   :  { %815 = vmatmul.f32.gmra.mxu3 %v4141_v42 }
  0xea   :  { %v921_v31 = vand.u32 4294901760, %v4180_v12  ;;  %v593_v55 = vpop.f32.mrf.mxu3  ;;  %v986_v63 = vand.u32 4294901760, %v985_v34  ;;  %v992_v35 = vand.u32 4294901760, %v991_v58 }
  0xeb   :  { %v523_v14 = vpop.f32.mrf.mxu1  ;;  %771 = vmatmul.f32.gmra.mxu2 %v4131_v26 }
  0xec   :  { %v524_v15 = vadd.f32 %v523_v14, %v482_v36  ;;  %v559_v61 = vpop.f32.mrf.mxu2  ;;  %v979_v3 = vsub.f32 %v4180_v12, %v921_v31  ;;  %v987_v23 = vsub.f32 %v985_v34, %v986_v63  ;;  %v993_v36 = vsub.f32 %v991_v58, %v992_v35  ;;  %v71_v14 = vld [vmem:[%s5107_s5 + $0x18] sm:$0xff] }
  0xed   :  { %613 = vperm.xlu2 %3831, %v71_v14  }
  0xee   :  { %v560_v22 = vadd.f32 %v559_v61, %v524_v15  ;;  %v980_v47 = vand.u32 4294901760, %v979_v3  ;;  %v988_v15 = vand.u32 4294901760, %v987_v23  ;;  %v994_v61 = vand.u32 4294901760, %v993_v36 }
  0xef   :  { %678 = vmatmul.f32.gmra.mxu0 %v4186_v4  ;;  %727 = vmatmul.f32.gmra.mxu1 %v4116_v57 }
  0xf0   :  { %v4196_v25 = vadd.f32 %v593_v55, %v560_v22  ;;  %v981_v52 = vsub.f32 %v979_v3, %v980_v47 }
  0xf1   :  { %821 = vmatmul.f32.gmra.mxu3 %v4167_v9 }
  0xf2   :  { %v919_v41 = vand.u32 4294901760, %v4196_v25  ;;  %v982_v50 = vand.u32 4294901760, %v981_v52 }
  0xf3   :  { %776 = vmatmul.f32.gmra.mxu2 %v4155_v16 }
  0xf4   :  { %v973_v29 = vsub.f32 %v4196_v25, %v919_v41  ;;  %920 = vmatpush.msra.mxu2 %v919_v41  ;;  %1071 = vmatpush.msrb.mxu1 %v919_v41 }
  0xf6   :  { %922 = vmatpush.msra.mxu2 %v921_v31  ;;  %1027 = vmatpush.msrb.mxu0 %v973_v29  ;;  %v974_v49 = vand.u32 4294901760, %v973_v29 }
  0xf7   :  { %1073 = vmatpush.msrb.mxu1 %v921_v31  ;;  %854 = vmatmul.f32.vlgmr.msra.gmra.mxu0 %v4044_v51 }
  0xf8   :  { %731 = vmatmul.f32.gmra.mxu1 %v4143_v62  ;;  %924 = vmatpush.msra.mxu2 %v923_v43  ;;  %v975_v18 = vsub.f32 %v973_v29, %v974_v49 }
  0xf9   :  { %1030 = vmatpush.msrb.mxu0 %v979_v3  ;;  %1075 = vmatpush.msrb.mxu1 %v923_v43 }
  0xfa   :  { %926 = vmatpush.msra.mxu2 %v925_v56  ;;  %v976_v32 = vand.u32 4294901760, %v975_v18 }
  0xfb   :  { %1033 = vmatpush.msrb.mxu0 %v985_v34  ;;  %1077 = vmatpush.msrb.mxu1 %v925_v56 }
  0xfc   :  { %932 = vmatmul.f32.vlgmr.msra.gmra.mxu2 %v4111_v53  ;;  %977 = vmatpush.msra.mxu3 %v976_v32  ;;  %v4246_v32 = vpop.permute.xlu1 %603 }
  0xfd   :  { %1118 = vmatpush.msrb.mxu2 %v974_v49  ;;  %1036 = vmatpush.msrb.mxu0 %v991_v58  ;;  %5191 = vst [vmem:[#allocation24_spill] sm:$0xff] %v4246_v32 }
  0xfe   :  { %983 = vmatpush.msra.mxu3 %v982_v50 }
  0xff   :  { %1122 = vmatpush.msrb.mxu2 %v980_v47  ;;  %858 = vmatmul.f32.gmra.mxu0 %v4074_v2 }
 0x100   :  { %891 = vmatmul.f32.vlgmr.msra.gmra.mxu1 %v4044_v51  ;;  %989 = vmatpush.msra.mxu3 %v988_v15 }
 0x101   :  { %1126 = vmatpush.msrb.mxu2 %v986_v63 }
 0x102   :  { %995 = vmatpush.msra.mxu3 %v994_v61 }
 0x103   :  { %1130 = vmatpush.msrb.mxu2 %v992_v35  ;;  %997 = vmatmul.f32.vlgmr.msra.gmra.mxu3 %v4044_v51  ;;  %v4244_v35 = vpop.permute.xlu0 %598 }
 0x104   :  { %940 = vmatmul.f32.gmra.mxu2 %v4138_v40  ;;  %1161 = vmatpush.msrb.mxu3 %v919_v41  ;;  %5190 = vst [vmem:[#allocation23_spill] sm:$0xff] %v4244_v35 }
 0x106   :  { %1163 = vmatpush.msrb.mxu3 %v921_v31 }
 0x107   :  { %862 = vmatmul.f32.gmra.mxu0 %v4116_v57 }
 0x108   :  { %895 = vmatmul.f32.gmra.mxu1 %v4074_v2  ;;  %1165 = vmatpush.msrb.mxu3 %v923_v43 }
 0x10a   :  { %1167 = vmatpush.msrb.mxu3 %v925_v56 }
 0x10b   :  { %1001 = vmatmul.f32.gmra.mxu3 %v4074_v2 }
 0x10c   :  { %948 = vmatmul.f32.gmra.mxu2 %v4164_v59 }
 0x10f   :  { %866 = vmatmul.f32.gmra.mxu0 %v4143_v62 }
 0x110   :  { %899 = vmatmul.f32.gmra.mxu1 %v4116_v57 }
 0x113   :  { %1005 = vmatmul.f32.gmra.mxu3 %v4116_v57 }
 0x114   :  { %956 = vmatmul.f32.gmra.mxu2 %v4186_v4 }
 0x117   :  { %1039 = vmatmul.f32.vlgmr.msrb.gmra.mxu0 %v4056_v60 }
 0x118   :  { %903 = vmatmul.f32.gmra.mxu1 %v4143_v62 }
 0x11b   :  { %1009 = vmatmul.f32.gmra.mxu3 %v4143_v62 }
 0x11c   :  { %1132 = vmatmul.f32.vlgmr.msrb.gmra.mxu2 %v4044_v51 }
 0x11f   :  { %1044 = vmatmul.f32.gmra.mxu0 %v4096_v33 }
 0x120   :  { %1081 = vmatmul.f32.vlgmr.msrb.gmra.mxu1 %v4072_v19 }
 0x123   :  { %1169 = vmatmul.f32.vlgmr.msrb.gmra.mxu3 %v4044_v51 }
 0x124   :  { %1136 = vmatmul.f32.gmra.mxu2 %v4074_v2 }
 0x127   :  { %1049 = vmatmul.f32.gmra.mxu0 %v4131_v26 }
 0x128   :  { %1087 = vmatmul.f32.gmra.mxu1 %v4114_v54 }
 0x12b   :  { %1173 = vmatmul.f32.gmra.mxu3 %v4074_v2 }
 0x12c   :  { %1140 = vmatmul.f32.gmra.mxu2 %v4116_v57 }
 0x12f   :  { %1054 = vmatmul.f32.gmra.mxu0 %v4155_v16 }
 0x130   :  { %1093 = vmatmul.f32.gmra.mxu1 %v4141_v42 }
 0x133   :  { %1177 = vmatmul.f32.gmra.mxu3 %v4116_v57 }
 0x134   :  { %1144 = vmatmul.f32.gmra.mxu2 %v4143_v62 }
 0x138   :  { %1099 = vmatmul.f32.gmra.mxu1 %v4167_v9 }
 0x13b   :  { %1181 = vmatmul.f32.gmra.mxu3 %v4143_v62 }
 0x13d   :  { %v4250_v36 = vpop.permute.xlu2 %608 }
 0x13e   :  { %5192 = vst [vmem:[#allocation25_spill] sm:$0xff] %v4250_v36 }
 0x147   :  { %v4254_v2 = vpop.permute.xlu2 %613 }
 0x148   :  { %5193 = vst [vmem:[#allocation26_spill] sm:$0xff] %v4254_v2 }
 0x154   :  { %v655_v31 = vpop.f32.mrf.mxu0 }
 0x155   :  { %v656_v23 = vadd.f32 %v655_v31, %v4244_v35 }
 0x15c   :  { %v663_v55 = vpop.f32.mrf.mxu0  ;;  %v720_v43 = vpop.f32.mrf.mxu1 }
 0x15d   :  { %v804_v56 = vpop.f32.mrf.mxu3  ;;  %v664_v50 = vadd.f32 %v663_v55, %v4246_v32  ;;  %v721_v14 = vadd.f32 %v720_v43, %v656_v23 }
 0x15e   :  { %v762_v22 = vpop.f32.mrf.mxu2 }
 0x15f   :  { %v763_v9 = vadd.f32 %v762_v22, %v721_v14 }
 0x161   :  { %v805_v26 = vadd.f32 %v804_v56, %v763_v9  ;;  %v72_v9 = vlaneseq }
 0x163   :  { %v4258_v40 = vshrl.u32 %v72_v9, 7 }
 0x164   :  { %v671_v3 = vpop.f32.mrf.mxu0  ;;  %v724_v41 = vpop.f32.mrf.mxu1 }
 0x165   :  { %v810_v29 = vpop.f32.mrf.mxu3  ;;  %v725_v15 = vadd.f32 %v724_v41, %v664_v50  ;;  %v672_v55 = vadd.f32 %v671_v3, %v4250_v36 }
 0x166   :  { %v767_v34 = vpop.f32.mrf.mxu2 }
 0x167   :  { %v768_v57 = vadd.f32 %v767_v34, %v725_v15 }
 0x169   :  { %v811_v42 = vadd.f32 %v810_v29, %v768_v57 }
 0x16c   :  { %v679_v58 = vpop.f32.mrf.mxu0  ;;  %v728_v47 = vpop.f32.mrf.mxu1 }
 0x16d   :  { %v816_v49 = vpop.f32.mrf.mxu3  ;;  %v680_v43 = vadd.f32 %v679_v58, %v4254_v2  ;;  %v729_v34 = vadd.f32 %v728_v47, %v672_v55  ;;  %v4263_v58 = vadd.s32 8, %v4258_v40 }
 0x16e   :  { %v772_v28 = vpop.f32.mrf.mxu2 }
 0x174   :  { %v855_v63 = vpop.f32.mrf.mxu0 }
 0x175   :  { %v732_v18 = vpop.f32.mrf.mxu1  ;;  %v822_v62 = vpop.f32.mrf.mxu3  ;;  %v856_v59 = vadd.f32 %v855_v63, %v805_v26  ;;  %v773_v26 = vadd.f32 %v772_v28, %v729_v34 }
 0x176   :  { %v777_v52 = vpop.f32.mrf.mxu2  ;;  %v733_v14 = vadd.f32 %v732_v18, %v680_v43 }
 0x17c   :  { %v859_v61 = vpop.f32.mrf.mxu0 }
 0x17d   :  { %v892_v16 = vpop.f32.mrf.mxu1  ;;  %v860_v33 = vadd.f32 %v859_v61, %v811_v42  ;;  %v778_v42 = vadd.f32 %v777_v52, %v733_v14 }
 0x17e   :  { %v893_v41 = vadd.f32 %v892_v16, %v856_v59 }
 0x17f   :  { %v4252_v4 = vpop.f32.mrf.mxu2 }
 0x184   :  { %v863_v31 = vpop.f32.mrf.mxu0 }
 0x185   :  { %v896_v54 = vpop.f32.mrf.mxu1 }
 0x186   :  { %v897_v23 = vadd.f32 %v896_v54, %v860_v33  ;;  %v998_v50 = vpop.f32.mrf.mxu3  ;;  %v817_v33 = vadd.f32 %v816_v49, %v773_v26  ;;  %v823_v54 = vadd.f32 %v822_v62, %v778_v42 }
 0x187   :  { %v941_v51 = vpop.f32.mrf.mxu2 }
 0x188   :  { %v1185_v22 = vmax.f32 %v893_v41, %v897_v23  ;;  %v864_v47 = vadd.f32 %v863_v31, %v817_v33 }
 0x18a   :  { %v1186_v15 = vrot.slane %v1185_v22, 4 }
 0x18c   :  { %v1187_v57 = vmax.f32 %v1185_v22, %v1186_v15  ;;  %v867_v56 = vpop.f32.mrf.mxu0 }
 0x18d   :  { %v900_v29 = vpop.f32.mrf.mxu1  ;;  %v868_v55 = vadd.f32 %v867_v56, %v823_v54 }
 0x18e   :  { %v1188_v63 = vrot.slane %v1187_v57, 2  ;;  %v1002_v61 = vpop.f32.mrf.mxu3  ;;  %v901_v28 = vadd.f32 %v900_v29, %v864_v47  ;;  %v934_v47 = vadd.f32 %v4252_v4, %v4244_v35  ;;  %v67_v35 = vld [vmem:[%s5109_s4 + $0x18] sm:$0xff] }
 0x18f   :  { %v4260_v3 = vpop.f32.mrf.mxu2 }
 0x190   :  { %v1189_v16 = vmax.f32 %v1187_v57, %v1188_v63 }
 0x192   :  { %v1190_v59 = vrot.slane %v1189_v16, 1 }
 0x194   :  { %v1191_v18 = vmax.f32 %v1189_v16, %v1190_v59  ;;  %v1040_v22 = vpop.f32.mrf.mxu0  ;;  %v64_v59 = vld [vmem:[%s5109_s4] sm:$0xff] }
 0x195   :  { %v904_v43 = vpop.f32.mrf.mxu1 }
 0x196   :  { %vm1199_vm3 = vcmp.ge.f32.partialorder %v893_v41, %v1191_v18  ;;  %vm1201_vm4 = vcmp.ge.f32.partialorder %v897_v23, %v1191_v18  ;;  %v905_v52 = vadd.f32 %v904_v43, %v868_v55  ;;  %v4265_v34 = vpop.f32.mrf.mxu3  ;;  %v942_v18 = vadd.f32 %v941_v51, %v4246_v32 }
 0x197   :  { %v1203_v14 = vsel %vm1199_vm3, %v4258_v40, 16  ;;  %v1205_v49 = vsel %vm1201_vm4, %v4263_v58, 16  ;;  %v4269_v62 = vpop.f32.mrf.mxu2 }
 0x198   :  { %vm1207_vm5 = vcmp.lt.s32.totalorder %v1203_v14, %v1205_v49  ;;  %v1241_v15 = vmax.f32 %v901_v28, %v905_v52 }
 0x199   :  { %v1208_v9 = vsel %vm1207_vm5, %v1203_v14, %v1205_v49  ;;  %v999_v14 = vadd.f32 %v998_v50, %v934_v47  ;;  %v1003_v49 = vadd.f32 %v1002_v61, %v942_v18 }
 0x19a   :  { %v1209_v31 = vrot.slane %v1208_v9, 4  ;;  %v1242_v57 = vrot.slane %v1241_v15, 4 }
 0x19b   :  { %v1041_v60 = vadd.f32 %v1040_v22, %v999_v14 }
 0x19c   :  { %vm1210_vm6 = vcmp.lt.s32.totalorder %v1208_v9, %v1209_v31  ;;  %v1243_v56 = vmax.f32 %v1241_v15, %v1242_v57  ;;  %v1045_v33 = vpop.f32.mrf.mxu0 }
 0x19d   :  { %v1082_v41 = vpop.f32.mrf.mxu1  ;;  %v1211_v23 = vsel %vm1210_vm6, %v1208_v9, %v1209_v31  ;;  %v1298_v9 = vsel %vm616_vm2, %v64_v59, 0  ;;  %v1046_v19 = vadd.f32 %v1045_v33, %v1003_v49 }
 0x19e   :  { %v1244_v29 = vrot.slane %v1243_v56, 2  ;;  %v4271_v26 = vpop.f32.mrf.mxu3  ;;  %v1212_v42 = vrot.slane %v1211_v23, 2  ;;  %v4282_v51 = vand.u32 4294901760, %v1298_v9  ;;  %v1083_v50 = vadd.f32 %v1082_v41, %v1041_v60 }
 0x19f   :  { %v1133_v63 = vpop.f32.mrf.mxu2 }
 0x1a0   :  { %v1245_v16 = vmax.f32 %v1243_v56, %v1244_v29  ;;  %vm1213_vm7 = vcmp.lt.s32.totalorder %v1211_v23, %v1212_v42 }
 0x1a1   :  { %v1214_v55 = vsel %vm1213_vm7, %v1211_v23, %v1212_v42 }
 0x1a2   :  { %v1246_v54 = vrot.slane %v1245_v16, 1  ;;  %v1215_v57 = vrot.slane %v1214_v55, 1 }
 0x1a4   :  { %v1247_v43 = vmax.f32 %v1245_v16, %v1246_v54  ;;  %v1050_v42 = vpop.f32.mrf.mxu0  ;;  %vm1216_vm11 = vcmp.lt.s32.totalorder %v1214_v55, %v1215_v57  ;;  %v4288_v16 = vsub.f32 %v1298_v9, %v4282_v51  ;;  %v1134_v54 = vadd.f32 %v1133_v63, %v1083_v50 }
 0x1a5   :  { %v1088_v15 = vpop.f32.mrf.mxu1  ;;  %v4291_v18 = vsel %vm1216_vm11, %v1214_v55, %v1215_v57  ;;  %v950_v63 = vadd.f32 %v4260_v3, %v4250_v36 }
 0x1a6   :  { %vm1255_vm8 = vcmp.ge.f32.partialorder %v901_v28, %v1247_v43  ;;  %vm1257_vm9 = vcmp.ge.f32.partialorder %v905_v52, %v1247_v43  ;;  %v1170_v31 = vpop.f32.mrf.mxu3  ;;  %v1089_v61 = vadd.f32 %v1088_v15, %v1046_v19  ;;  %v65_v28 = vld [vmem:[%s5109_s4 + $0x8] sm:$0xff]  ;;  %vm1231_vm14 = vcmp.eq.s32.totalorder %v4263_v58, %v4291_v18 }
 0x1a7   :  { %v1259_v56 = vsel %vm1255_vm8, %v4258_v40, 16  ;;  %v1261_v29 = vsel %vm1257_vm9, %v4263_v58, 16  ;;  %v1137_v4 = vpop.f32.mrf.mxu2  ;;  %v1301_v22 = vsel %vm616_vm2, %v65_v28, 0  ;;  %v4293_v41 = vadd.f32 %v1170_v31, %v1134_v54 }
 0x1a8   :  { %vm1263_vm10 = vcmp.lt.s32.totalorder %v1259_v56, %v1261_v29  ;;  %v1138_v59 = vadd.f32 %v1137_v4, %v1089_v61  ;;  %v4300_v49 = vand.u32 4294901760, %v4288_v16  ;;  %v4302_v15 = vand.u32 4294901760, %v1301_v22 }
 0x1a9   :  { %v1264_v23 = vsel %vm1263_vm10, %v1259_v56, %v1261_v29  ;;  %v958_v31 = vadd.f32 %v4269_v62, %v4254_v2  ;;  %vm1229_vm15 = vcmp.eq.s32.totalorder %v4258_v40, %v4291_v18  ;;  %v66_v56 = vld [vmem:[%s5109_s4 + $0x10] sm:$0xff]  ;;  %v1007_v29 = vadd.f32 %v4265_v34, %v950_v63 }
 0x1aa   :  { %v1265_v52 = vrot.slane %v1264_v23, 4  ;;  %v1332_v61 = vsub.f32 %v4288_v16, %v4300_v49  ;;  %v4326_v28 = vsub.f32 %v1301_v22, %v4302_v15  ;;  %v1304_v54 = vsel %vm616_vm2, %v66_v56, 0 }
 0x1ab   :  { %v1011_v62 = vadd.f32 %v4271_v26, %v958_v31  ;;  %v1051_v26 = vadd.f32 %v1050_v42, %v1007_v29 }
 0x1ac   :  { %vm1266_vm12 = vcmp.lt.s32.totalorder %v1264_v23, %v1265_v52  ;;  %v1055_v50 = vpop.f32.mrf.mxu0 }
 0x1ad   :  { %v1267_v33 = vsel %vm1266_vm12, %v1264_v23, %v1265_v52  ;;  %v1094_v47 = vpop.f32.mrf.mxu1  ;;  %v5147_v23 = vmov 0.0  }
 0x1ae   :  { %v1268_v60 = vrot.slane %v1267_v33, 2  ;;  %v1174_v19 = vpop.f32.mrf.mxu3  ;;  %v4320_v3 = vsel %vm1231_vm14, 1.0, %v5147_v23  ;;  %v1095_v31 = vadd.f32 %v1094_v47, %v1051_v26  ;;  %v4381_v47 = vand.u32 4294901760, %v1332_v61 }
 0x1af   :  { %v4295_v43 = vadd.f32 %v1174_v19, %v1138_v59  ;;  %v1141_v14 = vpop.f32.mrf.mxu2  ;;  %v4343_v22 = vsub.f32 %v4320_v3, %v4320_v3  ;;  %v1056_v19 = vadd.f32 %v1055_v50, %v1011_v62  ;;  %v4384_v50 = vand.u32 4294901760, %v4326_v28 }
 0x1b0   :  { %vm1269_vm13 = vcmp.lt.s32.totalorder %v1267_v33, %v1268_v60  ;;  %v1142_v61 = vadd.f32 %v1141_v14, %v1095_v31 }
 0x1b1   :  { %v1192_v55 = vmax.f32 %v4293_v41, %v4295_v43  ;;  %v1270_v9 = vsel %vm1269_vm13, %v1267_v33, %v1268_v60  ;;  %v4334_v33 = vsel %vm1229_vm15, 1.0, %v5147_v23  ;;  %v1340_v14 = vsub.f32 %v4326_v28, %v4384_v50 }
 0x1b2   :  { %v1271_v57 = vrot.slane %v1270_v9, 1  ;;  %v4371_v29 = vsub.f32 %v4334_v33, %v4334_v33 }
 0x1b3   :  { %v1193_v4 = vrot.slane %v1192_v55, 4 }
 0x1b4   :  { %vm1272_vm0 = vcmp.lt.s32.totalorder %v1270_v9, %v1271_v57  ;;  %v1394_v32 = vand.u32 4294901760, %v4371_v29 }
 0x1b5   :  { %v1194_v52 = vmax.f32 %v1192_v55, %v1193_v4  ;;  %v4328_v34 = vsel %vm1272_vm0, %v1270_v9, %v1271_v57  ;;  %v1100_v59 = vpop.f32.mrf.mxu1  ;;  %v5161_v55 = vmov 1.0  }
 0x1b6   :  { %v1178_v60 = vpop.f32.mrf.mxu3  ;;  %vm1287_vm3 = vcmp.eq.s32.totalorder %v4263_v58, %v4328_v34  ;;  %vm1285_vm4 = vcmp.eq.s32.totalorder %v4258_v40, %v4328_v34  ;;  %v1101_v62 = vadd.f32 %v1100_v59, %v1056_v19  ;;  %v1388_v59 = vand.u32 4294901760, %v4343_v22 }
 0x1b7   :  { %v1195_v63 = vrot.slane %v1194_v52, 2  ;;  %3761 = vmatpush.msk.msra.mxu0 %vm1287_vm3, %v5161_v55  ;;  %3765 = vmatpush.msk.msra.mxu3 %vm1287_vm3, %v5161_v55  ;;  %v4357_v42 = vsel %vm1287_vm3, 1.0, %v5147_v23  ;;  %v4363_v9 = vsel %vm1285_vm4, 1.0, %v5147_v23  ;;  %v1145_v26 = vpop.f32.mrf.mxu2  ;;  %v4387_v19 = vand.u32 4294901760, %v1304_v54 }
 0x1b8   :  { %v1375_v57 = vsub.f32 %v4357_v42, %v4357_v42  ;;  %v1381_v56 = vsub.f32 %v4363_v9, %v4363_v9  ;;  %v1146_v0 = vadd.f32 %v1145_v26, %v1101_v62  ;;  %v4411_v31 = vadd.f32 %v1178_v60, %v1142_v61 }
 0x1b9   :  { %v1196_v4 = vmax.f32 %v1194_v52, %v1195_v63  ;;  %3762 = vmatpush.msk.msra.mxu0 %vm1285_vm4, %v5161_v55  ;;  %3766 = vmatpush.msk.msra.mxu3 %vm1285_vm4, %v5161_v55  ;;  %v4417_v62 = vsub.f32 %v1304_v54, %v4387_v19  ;;  %v1307_v60 = vsel %vm616_vm2, %v67_v35, 0  ;;  %v1395_v54 = vsub.f32 %v4371_v29, %v1394_v32 }
 0x1ba   :  { %1429 = vmatpush.msra.mxu2 %v1375_v57  ;;  %v1376_v23 = vand.u32 4294901760, %v1375_v57  ;;  %v1382_v52 = vand.u32 4294901760, %v1381_v56 }
 0x1bb   :  { %v1197_v63 = vrot.slane %v1196_v4, 1  ;;  %3763 = vmatpush.msk.msra.mxu0 %vm1231_vm14, %v5161_v55  ;;  %3767 = vmatpush.msk.msra.mxu3 %vm1231_vm14, %v5161_v55 }
 0x1bc   :  { %1432 = vmatpush.msra.mxu2 %v1381_v56  ;;  %v1377_v2 = vsub.f32 %v1375_v57, %v1376_v23  ;;  %v1383_v36 = vsub.f32 %v1381_v56, %v1382_v52 }
 0x1bd   :  { %v1198_v53 = vmax.f32 %v1196_v4, %v1197_v63  ;;  %3764 = vmatpush.msk.msra.mxu0 %vm1229_vm15, %v5161_v55  ;;  %3768 = vmatpush.msk.msra.mxu3 %vm1229_vm15, %v5161_v55  ;;  %v1389_v4 = vsub.f32 %v4343_v22, %v1388_v59 }
 0x1be   :  { %1334 = vmatmul.f32.vlgmr.msra.gmra.mxu0 %v4381_v47  ;;  %1435 = vmatpush.msra.mxu2 %v4343_v22  ;;  %v1182_v57 = vpop.f32.mrf.mxu3  ;;  %v1378_v56 = vand.u32 4294901760, %v1377_v2  ;;  %v1384_v2 = vand.u32 4294901760, %v1383_v36 }
 0x1bf   :  { %vm1200_vm5 = vcmp.ge.f32.partialorder %v4293_v41, %v1198_v53  ;;  %vm1202_vm6 = vcmp.ge.f32.partialorder %v4295_v43, %v1198_v53  ;;  %1520 = vmatpush.msrb.mxu0 %v1376_v23  ;;  %v1183_v26 = vadd.f32 %v1182_v57, %v1146_v0  ;;  %1483 = vmatmul.f32.vlgmr.msra.gmra.mxu3 %v4300_v49  ;;  %v4428_v53 = vand.u32 4294901760, %v1340_v14 }
 0x1c0   :  { %v1204_v63 = vsel %vm1200_vm5, %v4258_v40, 16  ;;  %v1206_v61 = vsel %vm1202_vm6, %v4263_v58, 16  ;;  %1379 = vmatpush.msra.mxu1 %v1378_v56  ;;  %1438 = vmatpush.msra.mxu2 %v4371_v29  ;;  %v1390_v35 = vand.u32 4294901760, %v1389_v4  ;;  %v4432_v43 = vand.u32 4294901760, %v4417_v62 }
 0x1c1   :  { %vm1218_vm7 = vcmp.lt.s32.totalorder %v1204_v63, %v1206_v61  ;;  %v1248_v41 = vmax.f32 %v4411_v31, %v1183_v26  ;;  %1524 = vmatpush.msrb.mxu0 %v1382_v52  ;;  %1441 = vmatmul.f32.vlgmr.msra.gmra.mxu2 %v4288_v16  ;;  %v4434_v23 = vand.u32 4294901760, %v1307_v60  ;;  %v1396_v29 = vand.u32 4294901760, %v1395_v54 }
 0x1c2   :  { %v1219_v0 = vsel %vm1218_vm7, %v1204_v63, %v1206_v61  ;;  %1385 = vmatpush.msra.mxu1 %v1384_v2  ;;  %v1348_v14 = vsub.f32 %v4417_v62, %v4432_v43 }
 0x1c3   :  { %5194 = vst [vmem:[#allocation27_spill] sm:$0xff] %v4434_v23  ;;  %v1220_v22 = vrot.slane %v1219_v0, 4  ;;  %v1249_v36 = vrot.slane %v1248_v41, 4  ;;  %1528 = vmatpush.msrb.mxu0 %v1388_v59  ;;  %v4440_v56 = vsub.f32 %v1307_v60, %v4434_v23 }
 0x1c4   :  { %1391 = vmatpush.msra.mxu1 %v1390_v35  ;;  %v4453_v59 = vand.u32 4294901760, %v1348_v14 }
 0x1c5   :  { %vm1221_vm2 = vcmp.lt.s32.totalorder %v1219_v0, %v1220_v22  ;;  %v1250_v57 = vmax.f32 %v1248_v41, %v1249_v36  ;;  %1532 = vmatpush.msrb.mxu0 %v1394_v32  ;;  %v4456_v61 = vand.u32 4294901760, %v4440_v56 }
 0x1c6   :  { %v1222_v52 = vsel %vm1221_vm2, %v1219_v0, %v1220_v22  ;;  %1342 = vmatmul.f32.gmra.mxu0 %v4428_v53  ;;  %1397 = vmatpush.msra.mxu1 %v1396_v29  ;;  %v5195_v22 = vmov 0.0  }
 0x1c7   :  { %v1223_v4 = vrot.slane %v1222_v52, 2  ;;  %v1251_v63 = vrot.slane %v1250_v57, 2  ;;  %1399 = vmatmul.f32.vlgmr.msra.gmra.mxu1 %v4282_v51  ;;  %1489 = vmatmul.f32.gmra.mxu3 %v4384_v50  ;;  %v1356_v0 = vsub.f32 %v4440_v56, %v4456_v61 }
 0x1c8   :  { %3769 = vmatpush.msk.msrb.mxu1 %vm1287_vm3, %v5161_v55 }
 0x1c9   :  { %vm1224_vm8 = vcmp.lt.s32.totalorder %v1222_v52, %v1223_v4  ;;  %v1252_v32 = vmax.f32 %v1250_v57, %v1251_v63  ;;  %1446 = vmatmul.f32.gmra.mxu2 %v4326_v28 }
 0x1ca   :  { %3770 = vmatpush.msk.msrb.mxu1 %vm1285_vm4, %v5161_v55  ;;  %v1225_v60 = vsel %vm1224_vm8, %v1222_v52, %v1223_v4  ;;  %v4491_v52 = vand.u32 4294901760, %v1356_v0 }
 0x1cb   :  { %v1253_v2 = vrot.slane %v1252_v32, 1  ;;  %v1226_v54 = vrot.slane %v1225_v60, 1 }
 0x1cc   :  { %3771 = vmatpush.msk.msrb.mxu1 %vm1231_vm14, %v5161_v55 }
 0x1cd   :  { %v1254_v41 = vmax.f32 %v1252_v32, %v1253_v2  ;;  %vm1227_vm9 = vcmp.lt.s32.totalorder %v1225_v60, %v1226_v54 }
 0x1ce   :  { %3772 = vmatpush.msk.msrb.mxu1 %vm1229_vm15, %v5161_v55  ;;  %1350 = vmatmul.f32.gmra.mxu0 %v4453_v59  ;;  %v4467_v34 = vsel %vm1227_vm9, %v1225_v60, %v1226_v54 }
 0x1cf   :  { %vm1256_vm10 = vcmp.ge.f32.partialorder %v4411_v31, %v1254_v41  ;;  %vm1258_vm11 = vcmp.ge.f32.partialorder %v1183_v26, %v1254_v41  ;;  %1403 = vmatmul.f32.gmra.mxu1 %v4302_v15  ;;  %vm1232_vm12 = vcmp.eq.s32.totalorder %v4263_v58, %v4467_v34  ;;  %vm1230_vm13 = vcmp.eq.s32.totalorder %v4258_v40, %v4467_v34 }
 0x1d0   :  { %v1260_v18 = vsel %vm1256_vm10, %v4258_v40, 16  ;;  %v1262_v35 = vsel %vm1258_vm11, %v4263_v58, 16  ;;  %v3756_v36 = vsel %vm1232_vm12, 1.0, %v5195_v22  ;;  %v3754_v31 = vsel %vm1230_vm13, 1.0, %v5195_v22  ;;  %1495 = vmatmul.f32.gmra.mxu3 %v4432_v43 }
 0x1d1   :  { %vm1274_vm14 = vcmp.lt.s32.totalorder %v1260_v18, %v1262_v35  ;;  %v1876_v26 = vadd.f32 %v3756_v36, %v4320_v3  ;;  %1451 = vmatmul.f32.gmra.mxu2 %v4417_v62  ;;  %v1873_v57 = vadd.f32 %v3754_v31, %v4334_v33  ;;  %v1665_v60 = vsub.f32 %v3756_v36, %v3756_v36 }
 0x1d2   :  { %v1275_v29 = vsel %vm1274_vm14, %v1260_v18, %v1262_v35  ;;  %v1671_v36 = vsub.f32 %v3754_v31, %v3754_v31 }
 0x1d3   :  { %v1276_v14 = vrot.slane %v1275_v29, 4  ;;  %1877 = vadd.xlane.f32.xlu0 %v1876_v26  ;;  %1874 = vadd.xlane.f32.xlu2 %v1873_v57 }
 0x1d4   :  { %v1672_v57 = vand.u32 4294901760, %v1671_v36 }
 0x1d5   :  { %vm1277_vm15 = vcmp.lt.s32.totalorder %v1275_v29, %v1276_v14 }
 0x1d6   :  { %v1278_v4 = vsel %vm1277_vm15, %v1275_v29, %v1276_v14  ;;  %1358 = vmatmul.f32.gmra.mxu0 %v4491_v52 }
 0x1d7   :  { %v1279_v63 = vrot.slane %v1278_v4, 2  ;;  %1407 = vmatmul.f32.gmra.mxu1 %v4387_v19 }
 0x1d8   :  { %1501 = vmatmul.f32.gmra.mxu3 %v4456_v61 }
 0x1d9   :  { %1456 = vmatmul.f32.gmra.mxu2 %v4440_v56  ;;  %vm1280_vm0 = vcmp.lt.s32.totalorder %v1278_v4, %v1279_v63 }
 0x1da   :  { %v1281_v3 = vsel %vm1280_vm0, %v1278_v4, %v1279_v63 }
 0x1db   :  { %v1282_v32 = vrot.slane %v1281_v3, 1 }
 0x1dd   :  { %vm1283_vm3 = vcmp.lt.s32.totalorder %v1281_v3, %v1282_v32 }
 0x1de   :  { %1534 = vmatmul.f32.vlgmr.msrb.gmra.mxu0 %v4282_v51  ;;  %v1284_v33 = vsel %vm1283_vm3, %v1281_v3, %v1282_v32  ;;  %v1673_v3 = vsub.f32 %v1671_v36, %v1672_v57 }
 0x1df   :  { %1411 = vmatmul.f32.gmra.mxu1 %v4434_v23  ;;  %vm1288_vm4 = vcmp.eq.s32.totalorder %v4263_v58, %v1284_v33  ;;  %vm1286_vm5 = vcmp.eq.s32.totalorder %v4258_v40, %v1284_v33  ;;  %v1925_v33 = vld.sshfl [vmem:[#allocation1] sm:$0xff pattern:$0x75316420] }
 0x1e0   :  { %3773 = vmatpush.msk.msrb.mxu2 %vm1288_vm4, %v5161_v55  ;;  %3777 = vmatpush.msk.msra.mxu1 %vm1288_vm4, %v5161_v55  ;;  %v3758_v2 = vsel %vm1286_vm5, 1.0, %v5195_v22  ;;  %v3760_v54 = vsel %vm1288_vm4, 1.0, %v5195_v22 }
 0x1e1   :  { %v1659_v41 = vsub.f32 %v3758_v2, %v3758_v2  ;;  %v1879_v0 = vadd.f32 %v3758_v2, %v4363_v9  ;;  %v1653_v18 = vsub.f32 %v3760_v54, %v3760_v54  ;;  %v1882_v35 = vadd.f32 %v3760_v54, %v4357_v42 }
 0x1e2   :  { %3774 = vmatpush.msk.msrb.mxu2 %vm1286_vm5, %v5161_v55  ;;  %3778 = vmatpush.msk.msra.mxu1 %vm1286_vm5, %v5161_v55  ;;  %v1666_v42 = vand.u32 4294901760, %v1665_v60  ;;  %v1674_v2 = vand.u32 4294901760, %v1673_v3 }
 0x1e3   :  { %1880 = vadd.xlane.f32.xlu1 %v1879_v0  ;;  %1883 = vadd.xlane.f32.xlu2 %v1882_v35  ;;  %v1654_v26 = vand.u32 4294901760, %v1653_v18  ;;  %v1660_v29 = vand.u32 4294901760, %v1659_v41  ;;  %v1926_v35 = vld.sshfl [vmem:[#allocation1 + $0x8] sm:$0xff pattern:$0x75316420] }
 0x1e4   :  { %1707 = vmatpush.msra.mxu0 %v1653_v18  ;;  %3775 = vmatpush.msk.msrb.mxu2 %vm1232_vm12, %v5161_v55  ;;  %v1667_v4 = vsub.f32 %v1665_v60, %v1666_v42 }
 0x1e5   :  { %3779 = vmatpush.msk.msra.mxu1 %vm1232_vm12, %v5161_v55  ;;  %v1655_v9 = vsub.f32 %v1653_v18, %v1654_v26  ;;  %v1661_v31 = vsub.f32 %v1659_v41, %v1660_v29 }
 0x1e6   :  { %1538 = vmatmul.f32.gmra.mxu0 %v4302_v15  ;;  %3776 = vmatpush.msk.msrb.mxu2 %vm1230_vm13, %v5161_v55  ;;  %v1668_v32 = vand.u32 4294901760, %v1667_v4 }
 0x1e7   :  { %1710 = vmatpush.msra.mxu0 %v1659_v41  ;;  %1571 = vmatmul.f32.vlgmr.msrb.gmra.mxu1 %v4282_v51  ;;  %v1656_v14 = vand.u32 4294901760, %v1655_v9  ;;  %v1662_v63 = vand.u32 4294901760, %v1661_v31 }
 0x1e8   :  { %3780 = vmatpush.msk.msra.mxu1 %vm1230_vm13, %v5161_v55  ;;  %1612 = vmatmul.f32.vlgmr.msrb.gmra.mxu2 %v4381_v47 }
 0x1e9   :  { %1713 = vmatpush.msra.mxu0 %v1665_v60  ;;  %1798 = vmatpush.msra.mxu2 %v1654_v26  ;;  %v1927_v60 = vsel %vm113_vm1, %v1925_v33, 0 }
 0x1ea   :  { %1657 = vmatpush.msrb.mxu3 %v1656_v14  ;;  %v1946_v54 = vand.u32 4294901760, %v1927_v60 }
 0x1eb   :  { %1716 = vmatpush.msra.mxu0 %v1671_v36  ;;  %1802 = vmatpush.msra.mxu2 %v1660_v29  ;;  %v1929_v36 = vsel %vm113_vm1, %v1926_v35, 0 }
 0x1ec   :  { %1663 = vmatpush.msrb.mxu3 %v1662_v63  ;;  %v1997_v41 = vsub.f32 %v1927_v60, %v1946_v54  ;;  %v2185_v26 = vand.u32 4294901760, %v1929_v36 }
 0x1ed   :  { %1806 = vmatpush.msra.mxu2 %v1666_v42  ;;  %1947 = vmatpush.msrb.mxu0 %v1946_v54 }
 0x1ee   :  { %1542 = vmatmul.f32.gmra.mxu0 %v4387_v19  ;;  %1669 = vmatpush.msrb.mxu3 %v1668_v32  ;;  %v1998_v34 = vand.u32 4294901760, %v1997_v41  ;;  %v2236_v29 = vsub.f32 %v1929_v36, %v2185_v26 }
 0x1ef   :  { %1810 = vmatpush.msra.mxu2 %v1672_v57  ;;  %1575 = vmatmul.f32.gmra.mxu1 %v4302_v15 }
 0x1f0   :  { %1620 = vmatmul.f32.gmra.mxu2 %v4428_v53  ;;  %1675 = vmatpush.msrb.mxu3 %v1674_v2  ;;  %v1999_v0 = vsub.f32 %v1997_v41, %v1998_v34  ;;  %v2237_v42 = vand.u32 4294901760, %v2236_v29 }
 0x1f1   :  { %1677 = vmatmul.f32.vlgmr.msrb.gmra.mxu3 %v4282_v51  ;;  %2036 = vmatpush.msrb.mxu2 %v1997_v41 }
 0x1f2   :  { %3781 = vmatpush.msk.msra.mxu3 %vm1288_vm4, %v5161_v55  ;;  %v2000_v18 = vand.u32 4294901760, %v1999_v0  ;;  %v2238_v9 = vsub.f32 %v2236_v29, %v2237_v42 }
 0x1f4   :  { %3782 = vmatpush.msk.msra.mxu3 %vm1286_vm5, %v5161_v55  ;;  %2001 = vmatpush.msrb.mxu1 %v2000_v18  ;;  %v2239_v31 = vand.u32 4294901760, %v2238_v9 }
 0x1f6   :  { %3783 = vmatpush.msk.msra.mxu3 %vm1232_vm12, %v5161_v55  ;;  %1546 = vmatmul.f32.gmra.mxu0 %v4434_v23 }
 0x1f7   :  { %1579 = vmatmul.f32.gmra.mxu1 %v4387_v19 }
 0x1f8   :  { %3784 = vmatpush.msk.msra.mxu3 %vm1230_vm13, %v5161_v55  ;;  %1628 = vmatmul.f32.gmra.mxu2 %v4453_v59  ;;  %v5216_v55 = vld [vmem:[#allocation22_spill] sm:$0xff] }
 0x1f9   :  { %1681 = vmatmul.f32.gmra.mxu3 %v4302_v15 }
 0x1fa   :  { %2074 = vmatpush.msrb.mxu3 %v1946_v54 }
 0x1fe   :  { %1719 = vmatmul.f32.vlgmr.msra.gmra.mxu0 %v4288_v16 }
 0x1ff   :  { %1583 = vmatmul.f32.gmra.mxu1 %v4434_v23  ;;  %2118 = vmatpush.msra.mxu0 %v1998_v34 }
 0x200   :  { %1636 = vmatmul.f32.gmra.mxu2 %v4491_v52 }
 0x201   :  { %1685 = vmatmul.f32.gmra.mxu3 %v4387_v19 }
 0x206   :  { %1724 = vmatmul.f32.gmra.mxu0 %v4326_v28 }
 0x207   :  { %1761 = vmatmul.f32.vlgmr.msra.gmra.mxu1 %v4300_v49 }
 0x208   :  { %1812 = vmatmul.f32.vlgmr.msra.gmra.mxu2 %v4282_v51  ;;  %2152 = vmatpush.msra.mxu1 %v1946_v54 }
 0x209   :  { %1689 = vmatmul.f32.gmra.mxu3 %v4434_v23  ;;  %2186 = vmatpush.msra.mxu2 %v2185_v26 }
 0x20e   :  { %1729 = vmatmul.f32.gmra.mxu0 %v4417_v62 }
 0x20f   :  { %1767 = vmatmul.f32.gmra.mxu1 %v4384_v50 }
 0x210   :  { %1816 = vmatmul.f32.gmra.mxu2 %v4302_v15 }
 0x211   :  { %1849 = vmatmul.f32.vlgmr.msra.gmra.mxu3 %v4282_v51 }
 0x212   :  { %2240 = vmatpush.msra.mxu3 %v2239_v31 }
 0x216   :  { %1734 = vmatmul.f32.gmra.mxu0 %v4440_v56 }
 0x217   :  { %1773 = vmatmul.f32.gmra.mxu1 %v4432_v43 }
 0x218   :  { %1820 = vmatmul.f32.gmra.mxu2 %v4387_v19 }
 0x219   :  { %1853 = vmatmul.f32.gmra.mxu3 %v4302_v15 }
 0x21e   :  { %1953 = vmatmul.f32.vlgmr.msrb.gmra.mxu0 %v3928_v24 }
 0x21f   :  { %1779 = vmatmul.f32.gmra.mxu1 %v4456_v61  ;;  %2275 = vmatpush.msrb.mxu0 %v2236_v29 }
 0x220   :  { %1824 = vmatmul.f32.gmra.mxu2 %v4434_v23 }
 0x221   :  { %1857 = vmatmul.f32.gmra.mxu3 %v4387_v19 }
 0x226   :  { %1961 = vmatmul.f32.gmra.mxu0 %v3946_v37 }
 0x227   :  { %2003 = vmatmul.f32.vlgmr.msrb.gmra.mxu1 %v3894_v7 }
 0x228   :  { %2039 = vmatmul.f32.vlgmr.msrb.gmra.mxu2 %v3902_v10  ;;  %2313 = vmatpush.msrb.mxu1 %v2185_v26 }
 0x229   :  { %1861 = vmatmul.f32.gmra.mxu3 %v4434_v23  ;;  %2357 = vmatpush.msrb.mxu2 %v2237_v42 }
 0x22e   :  { %1969 = vmatmul.f32.gmra.mxu0 %v3962_v45 }
 0x22f   :  { %2007 = vmatmul.f32.gmra.mxu1 %v3896_v8 }
 0x230   :  { %2044 = vmatmul.f32.gmra.mxu2 %v3905_v11 }
 0x231   :  { %2078 = vmatmul.f32.vlgmr.msrb.gmra.mxu3 %v3911_v13 }
 0x232   :  { %2391 = vmatpush.msrb.mxu3 %v2185_v26 }
 0x236   :  { %1977 = vmatmul.f32.gmra.mxu0 %v3973_v48 }
 0x237   :  { %2011 = vmatmul.f32.gmra.mxu1 %v3926_v21 }
 0x238   :  { %2049 = vmatmul.f32.gmra.mxu2 %v3939_v30 }
 0x239   :  { %2084 = vmatmul.f32.gmra.mxu3 %v3924_v20 }
 0x23b   :  { %v1335_v57 = vpop.f32.mrf.mxu0 }
 0x23e   :  { %2120 = vmatmul.f32.vlgmr.msra.gmra.mxu0 %v3894_v7 }
 0x23f   :  { %2015 = vmatmul.f32.gmra.mxu1 %v3951_v39 }
 0x240   :  { %2054 = vmatmul.f32.gmra.mxu2 %v3958_v44 }
 0x241   :  { %2090 = vmatmul.f32.gmra.mxu3 %v3949_v38 }
 0x242   :  { %v1484_v33 = vpop.f32.mrf.mxu3 }
 0x243   :  { %v1343_v14 = vpop.f32.mrf.mxu0 }
 0x244   :  { %v1400_v4 = vpop.f32.mrf.mxu1  ;;  %v1442_v63 = vpop.f32.mrf.mxu2 }
 0x245   :  { %v1401_v34 = vadd.f32 %v1400_v4, %v1335_v57 }
 0x246   :  { %2124 = vmatmul.f32.gmra.mxu0 %v3896_v8 }
 0x247   :  { %2154 = vmatmul.f32.vlgmr.msra.gmra.mxu1 %v3894_v7  ;;  %v1443_v35 = vadd.f32 %v1442_v63, %v1401_v34 }
 0x248   :  { %2192 = vmatmul.f32.vlgmr.msra.gmra.mxu2 %v3928_v24 }
 0x249   :  { %2096 = vmatmul.f32.gmra.mxu3 %v3965_v46  ;;  %v1485_v36 = vadd.f32 %v1484_v33, %v1443_v35 }
 0x24a   :  { %v1490_v41 = vpop.f32.mrf.mxu3 }
 0x24b   :  { %v1351_v3 = vpop.f32.mrf.mxu0 }
 0x24c   :  { %v1404_v32 = vpop.f32.mrf.mxu1  ;;  %v1447_v2 = vpop.f32.mrf.mxu2 }
 0x24e   :  { %2128 = vmatmul.f32.gmra.mxu0 %v3926_v21 }
 0x24f   :  { %2158 = vmatmul.f32.gmra.mxu1 %v3896_v8 }
 0x250   :  { %2200 = vmatmul.f32.gmra.mxu2 %v3946_v37  ;;  %v1405_v37 = vadd.f32 %v1404_v32, %v1343_v14 }
 0x251   :  { %2242 = vmatmul.f32.vlgmr.msra.gmra.mxu3 %v3894_v7 }
 0x252   :  { %v1448_v31 = vadd.f32 %v1447_v2, %v1405_v37 }
 0x253   :  { %v1359_v60 = vpop.f32.mrf.mxu0  ;;  %v1496_v29 = vpop.f32.mrf.mxu3 }
 0x254   :  { %v1408_v54 = vpop.f32.mrf.mxu1  ;;  %v1452_v24 = vpop.f32.mrf.mxu2 }
 0x256   :  { %2132 = vmatmul.f32.gmra.mxu0 %v3951_v39 }
 0x257   :  { %2162 = vmatmul.f32.gmra.mxu1 %v3926_v21 }
 0x258   :  { %2208 = vmatmul.f32.gmra.mxu2 %v3962_v45 }
 0x259   :  { %2246 = vmatmul.f32.gmra.mxu3 %v3896_v8 }
 0x25b   :  { %v1535_v0 = vpop.f32.mrf.mxu0  ;;  %v1502_v32 = vpop.f32.mrf.mxu3 }
 0x25c   :  { %v1412_v18 = vpop.f32.mrf.mxu1  ;;  %v1457_v26 = vpop.f32.mrf.mxu2  ;;  %v1536_v45 = vadd.f32 %v1535_v0, %v1485_v36 }
 0x25e   :  { %2278 = vmatmul.f32.vlgmr.msrb.gmra.mxu0 %v3902_v10  ;;  %v1409_v10 = vadd.f32 %v1408_v54, %v1351_v3 }
 0x25f   :  { %2166 = vmatmul.f32.gmra.mxu1 %v3951_v39 }
 0x260   :  { %2216 = vmatmul.f32.gmra.mxu2 %v3973_v48  ;;  %v1491_v48 = vadd.f32 %v1490_v41, %v1448_v31  ;;  %v1453_v33 = vadd.f32 %v1452_v24, %v1409_v10 }
 0x261   :  { %2250 = vmatmul.f32.gmra.mxu3 %v3926_v21 }
 0x263   :  { %v1539_v42 = vpop.f32.mrf.mxu0 }
 0x264   :  { %v1572_v9 = vpop.f32.mrf.mxu1  ;;  %v1540_v14 = vadd.f32 %v1539_v42, %v1491_v48 }
 0x265   :  { %v1573_v57 = vadd.f32 %v1572_v9, %v1536_v45 }
 0x266   :  { %2283 = vmatmul.f32.gmra.mxu0 %v3905_v11  ;;  %v1413_v11 = vadd.f32 %v1412_v18, %v1359_v60 }
 0x267   :  { %1865 = vst [vmem:[%s5110_s6] sm:$0xff] %v1573_v57  ;;  %2317 = vmatmul.f32.vlgmr.msrb.gmra.mxu1 %v3911_v13  ;;  %v1497_v13 = vadd.f32 %v1496_v29, %v1453_v33 }
 0x268   :  { %2359 = vmatmul.f32.vlgmr.msrb.gmra.mxu2 %v3894_v7  ;;  %v1458_v35 = vadd.f32 %v1457_v26, %v1413_v11  ;;  %v5196_v11 = vld [vmem:[#allocation7_spill] sm:$0xff] }
 0x269   :  { %2254 = vmatmul.f32.gmra.mxu3 %v3951_v39 }
 0x26b   :  { %v1543_v4 = vpop.f32.mrf.mxu0  ;;  %v1613_v63 = vpop.f32.mrf.mxu2 }
 0x26c   :  { %v1576_v2 = vpop.f32.mrf.mxu1  ;;  %v1544_v3 = vadd.f32 %v1543_v4, %v1497_v13 }
 0x26d   :  { %v4623_v34 = vadd.f32 %v1576_v2, %v1540_v14 }
 0x26e   :  { %2288 = vmatmul.f32.gmra.mxu0 %v3939_v30 }
 0x26f   :  { %1867 = vst [vmem:[%s5110_s6 + $0x10] sm:$0xff] %v4623_v34  ;;  %2323 = vmatmul.f32.gmra.mxu1 %v3924_v20 }
 0x270   :  { %2363 = vmatmul.f32.gmra.mxu2 %v3896_v8 }
 0x271   :  { %2393 = vmatmul.f32.vlgmr.msrb.gmra.mxu3 %v3894_v7  ;;  %v1503_v7 = vadd.f32 %v1502_v32, %v1458_v35 }
 0x273   :  { %v1547_v54 = vpop.f32.mrf.mxu0  ;;  %v1621_v24 = vpop.f32.mrf.mxu2 }
 0x274   :  { %v1580_v41 = vpop.f32.mrf.mxu1  ;;  %v1678_v0 = vpop.f32.mrf.mxu3  ;;  %v1548_v20 = vadd.f32 %v1547_v54, %v1503_v7 }
 0x275   :  { %v4633_v30 = vadd.f32 %v1580_v41, %v1544_v3  ;;  %v1679_v10 = vadd.f32 %v1678_v0, %v1613_v63 }
 0x276   :  { %2293 = vmatmul.f32.gmra.mxu0 %v3958_v44 }
 0x277   :  { %1869 = vst [vmem:[%s5110_s6 + $0x20] sm:$0xff] %v4633_v30  ;;  %2329 = vmatmul.f32.gmra.mxu1 %v3949_v38 }
 0x278   :  { %2367 = vmatmul.f32.gmra.mxu2 %v3926_v21 }
 0x279   :  { %2397 = vmatmul.f32.gmra.mxu3 %v3896_v8 }
 0x27b   :  { %v1629_v60 = vpop.f32.mrf.mxu2  ;;  %v1720_v18 = vpop.f32.mrf.mxu0 }
 0x27c   :  { %v1584_v37 = vpop.f32.mrf.mxu1  ;;  %v1682_v36 = vpop.f32.mrf.mxu3  ;;  %v1721_v48 = vadd.f32 %v1720_v18, %v1679_v10 }
 0x27d   :  { %v4643_v26 = vadd.f32 %v1584_v37, %v1548_v20  ;;  %v1683_v13 = vadd.f32 %v1682_v36, %v1621_v24 }
 0x27f   :  { %1871 = vst [vmem:[%s5110_s6 + $0x30] sm:$0xff] %v4643_v26  ;;  %2335 = vmatmul.f32.gmra.mxu1 %v3965_v46 }
 0x280   :  { %2371 = vmatmul.f32.gmra.mxu2 %v3951_v39 }
 0x281   :  { %2401 = vmatmul.f32.gmra.mxu3 %v3926_v21  ;;  %v1889_v21 = vsub.f32 %v1573_v57, %v5196_v11  ;;  %v5197_v57 = vld [vmem:[#allocation5_spill] sm:$0xff] }
 0x282   :  { %v1891_v24 = vsub.f32 %v4623_v34, %v5197_v57  ;;  %v5198_v34 = vld [vmem:[#allocation4_spill] sm:$0xff] }
 0x283   :  { %v1637_v38 = vpop.f32.mrf.mxu2  ;;  %v1725_v8 = vpop.f32.mrf.mxu0  ;;  %v1897_v63 = vmul.f32 %v1889_v21, %v1889_v21 }
 0x284   :  { %v1686_v44 = vpop.f32.mrf.mxu3  ;;  %v1762_v29 = vpop.f32.mrf.mxu1  ;;  %v1726_v54 = vadd.f32 %v1725_v8, %v1683_v13  ;;  %v1899_v10 = vmul.f32 %v1891_v24, %v1891_v24 }
 0x285   :  { %v1763_v14 = vadd.f32 %v1762_v29, %v1721_v48  ;;  %v1687_v36 = vadd.f32 %v1686_v44, %v1629_v60  ;;  %v1893_v60 = vsub.f32 %v4633_v30, %v5198_v34  ;;  %v5199_v30 = vld [vmem:[#allocation10_spill] sm:$0xff] }
 0x289   :  { %2405 = vmatmul.f32.gmra.mxu3 %v3951_v39 }
 0x28b   :  { %v1730_v45 = vpop.f32.mrf.mxu0  ;;  %v1813_v42 = vpop.f32.mrf.mxu2 }
 0x28c   :  { %v1690_v9 = vpop.f32.mrf.mxu3  ;;  %v1768_v31 = vpop.f32.mrf.mxu1  ;;  %v1814_v4 = vadd.f32 %v1813_v42, %v1763_v14  ;;  %v1731_v42 = vadd.f32 %v1730_v45, %v1687_v36 }
 0x28d   :  { %v1769_v41 = vadd.f32 %v1768_v31, %v1726_v54  ;;  %v1691_v44 = vadd.f32 %v1690_v9, %v1637_v38  ;;  %v1895_v38 = vsub.f32 %v4643_v26, %v5199_v30 }
 0x293   :  { %v1735_v32 = vpop.f32.mrf.mxu0  ;;  %v1817_v46 = vpop.f32.mrf.mxu2 }
 0x294   :  { %v1774_v2 = vpop.f32.mrf.mxu1  ;;  %v1850_v33 = vpop.f32.mrf.mxu3  ;;  %v1818_v35 = vadd.f32 %v1817_v46, %v1769_v41  ;;  %v1736_v13 = vadd.f32 %v1735_v32, %v1691_v44  ;;  %v1903_v32 = vmul.f32 %v1895_v38, %v1895_v38 }
 0x295   :  { %v1851_v3 = vadd.f32 %v1850_v33, %v1814_v4  ;;  %v1775_v31 = vadd.f32 %v1774_v2, %v1731_v42 }
 0x297   :  { %1866 = vst [vmem:[%s5110_s6 + $0x8] sm:$0xff] %v1851_v3  ;;  %v1890_v39 = vsub.f32 %v1851_v3, %v4189_v27  ;;  %v1901_v3 = vmul.f32 %v1893_v60, %v1893_v60 }
 0x299   :  { %v1898_v0 = vmul.f32 %v1890_v39, %v1890_v39 }
 0x29b   :  { %v1821_v7 = vpop.f32.mrf.mxu2  ;;  %v4658_v20 = vpop.f32.mrf.mxu0  ;;  %v1905_v18 = vadd.f32 %v1898_v0, %v1897_v63 }
 0x29c   :  { %v1780_v37 = vpop.f32.mrf.mxu1  ;;  %v1854_v29 = vpop.f32.mrf.mxu3  ;;  %v1822_v14 = vadd.f32 %v1821_v7, %v1775_v31 }
 0x29d   :  { %v1855_v8 = vadd.f32 %v1854_v29, %v1818_v35  ;;  %1906 = vadd.xlane.f32.xlu2 %v1905_v18  ;;  %v1781_v2 = vadd.f32 %v1780_v37, %v1736_v13 }
 0x29f   :  { %1868 = vst [vmem:[%s5110_s6 + $0x18] sm:$0xff] %v1855_v8  ;;  %v1892_v27 = vsub.f32 %v1855_v8, %v4183_v5 }
 0x2a1   :  { %v1900_v48 = vmul.f32 %v1892_v27, %v1892_v27 }
 0x2a3   :  { %v1825_v4 = vpop.f32.mrf.mxu2  ;;  %v1962_v46 = vpop.f32.mrf.mxu0  ;;  %v1908_v33 = vadd.f32 %v1900_v48, %v1899_v10 }
 0x2a4   :  { %v1858_v11 = vpop.f32.mrf.mxu3  ;;  %v2004_v21 = vpop.f32.mrf.mxu1  ;;  %v1826_v39 = vadd.f32 %v1825_v4, %v1781_v2  ;;  %v1963_v34 = vadd.f32 %v1962_v46, %v4020_v1 }
 0x2a5   :  { %v1859_v45 = vadd.f32 %v1858_v11, %v1822_v14  ;;  %1909 = vadd.xlane.f32.xlu0 %v1908_v33 }
 0x2a7   :  { %1870 = vst [vmem:[%s5110_s6 + $0x28] sm:$0xff] %v1859_v45  ;;  %v1894_v5 = vsub.f32 %v1859_v45, %v4180_v12  ;;  %v1955_v45 = vadd.f32 %v4658_v20, %v4029_v17 }
 0x2a9   :  { %v1902_v54 = vmul.f32 %v1894_v5, %v1894_v5  ;;  %v2005_v2 = vadd.f32 %v2004_v21, %v1955_v45 }
 0x2ab   :  { %v1970_v41 = vpop.f32.mrf.mxu0  ;;  %v2040_v63 = vpop.f32.mrf.mxu2  ;;  %v1911_v0 = vadd.f32 %v1902_v54, %v1901_v3 }
 0x2ac   :  { %v1862_v35 = vpop.f32.mrf.mxu3  ;;  %v2008_v7 = vpop.f32.mrf.mxu1  ;;  %v1971_v4 = vadd.f32 %v1970_v41, %v4022_v6 }
 0x2ad   :  { %v1863_v9 = vadd.f32 %v1862_v35, %v1826_v39  ;;  %1912 = vadd.xlane.f32.xlu1 %v1911_v0  ;;  %v2009_v13 = vadd.f32 %v2008_v7, %v1963_v34  ;;  %v2041_v39 = vadd.f32 %v2040_v63, %v2005_v2  ;;  %v5200_v0 = vld [vmem:[#allocation2_spill] sm:$0xff] }
 0x2af   :  { %1872 = vst [vmem:[%s5110_s6 + $0x38] sm:$0xff] %v1863_v9  ;;  %v1896_v12 = vsub.f32 %v1863_v9, %v4196_v25 }
 0x2b1   :  { %v1904_v18 = vmul.f32 %v1896_v12, %v1896_v12 }
 0x2b3   :  { %v1978_v37 = vpop.f32.mrf.mxu0  ;;  %v2045_v29 = vpop.f32.mrf.mxu2  ;;  %v1914_v57 = vadd.f32 %v1904_v18, %v1903_v32 }
 0x2b4   :  { %v2012_v24 = vpop.f32.mrf.mxu1  ;;  %v2079_v36 = vpop.f32.mrf.mxu3  ;;  %v2046_v3 = vadd.f32 %v2045_v29, %v2009_v13  ;;  %v1979_v35 = vadd.f32 %v1978_v37, %v5200_v0 }
 0x2b5   :  { %1915 = vadd.xlane.f32.xlu2 %v1914_v57  ;;  %v2013_v60 = vadd.f32 %v2012_v24, %v1971_v4  ;;  %v2080_v46 = vadd.f32 %v2079_v36, %v2041_v39 }
 0x2bb   :  { %v2050_v8 = vpop.f32.mrf.mxu2  ;;  %v2121_v42 = vpop.f32.mrf.mxu0 }
 0x2bc   :  { %v2016_v27 = vpop.f32.mrf.mxu1  ;;  %v2085_v26 = vpop.f32.mrf.mxu3  ;;  %v2051_v5 = vadd.f32 %v2050_v8, %v2013_v60  ;;  %v2122_v20 = vadd.f32 %v2121_v42, %v2080_v46 }
 0x2bd   :  { %v2086_v41 = vadd.f32 %v2085_v26, %v2046_v3  ;;  %v2017_v32 = vadd.f32 %v2016_v27, %v1979_v35 }
 0x2c3   :  { %v2055_v31 = vpop.f32.mrf.mxu2  ;;  %v2125_v10 = vpop.f32.mrf.mxu0 }
 0x2c4   :  { %v2091_v48 = vpop.f32.mrf.mxu3  ;;  %v2155_v14 = vpop.f32.mrf.mxu1  ;;  %v2126_v18 = vadd.f32 %v2125_v10, %v2086_v41  ;;  %v2056_v7 = vadd.f32 %v2055_v31, %v2017_v32  ;;  %v5206_v32 = vld [vmem:[#allocation8_spill] sm:$0xff] }
 0x2c5   :  { %v2092_v54 = vadd.f32 %v2091_v48, %v2051_v5  ;;  %v4693_v63 = vadd.f32 %v2155_v14, %v2122_v20 }
 0x2c7   :  { %5203 = vst [vmem:[#allocation4_spill] sm:$0xff] %v4693_v63  ;;  %v2427_v10 = vand.u32 4294901760, %v4693_v63 }
 0x2cb   :  { %v4679_v33 = vpop.f32.mrf.mxu2  ;;  %v2129_v44 = vpop.f32.mrf.mxu0 }
 0x2cc   :  { %v2097_v25 = vpop.f32.mrf.mxu3  ;;  %v2159_v11 = vpop.f32.mrf.mxu1  ;;  %v2130_v30 = vadd.f32 %v2129_v44, %v2092_v54 }
 0x2cd   :  { %v4691_v21 = vadd.f32 %v2159_v11, %v2126_v18  ;;  %v2098_v37 = vadd.f32 %v2097_v25, %v2056_v7  ;;  %v2493_v11 = vsub.f32 %v4693_v63, %v2427_v10 }
 0x2cf   :  { %5202 = vst [vmem:[#allocation5_spill] sm:$0xff] %v4691_v21  ;;  %v2425_v8 = vand.u32 4294901760, %v4691_v21  ;;  %v2494_v3 = vand.u32 4294901760, %v2493_v11 }
 0x2d1   :  { %v2487_v4 = vsub.f32 %v4691_v21, %v2425_v8  ;;  %v2495_v46 = vsub.f32 %v2493_v11, %v2494_v3  ;;  %v5218_v21 = vld [vmem:[#allocation21_spill] sm:$0xff] }
 0x2d3   :  { %v4685_v38 = vpop.f32.mrf.mxu2  ;;  %v2133_v29 = vpop.f32.mrf.mxu0  ;;  %v2488_v45 = vand.u32 4294901760, %v2487_v4 }
 0x2d4   :  { %v2163_v9 = vpop.f32.mrf.mxu1  ;;  %v4687_v12 = vpop.f32.mrf.mxu3  ;;  %v2134_v26 = vadd.f32 %v2133_v29, %v2098_v37  ;;  %v5207_v29 = vld [vmem:[#allocation6_spill] sm:$0xff]  ;;  %v2496_v37 = vand.u32 4294901760, %v2495_v46 }
 0x2d5   :  { %v4689_v57 = vadd.f32 %v2163_v9, %v2130_v30  ;;  %v2489_v35 = vsub.f32 %v2487_v4, %v2488_v45  ;;  %v5205_v30 = vld [vmem:[#allocation12_spill] sm:$0xff] }
 0x2d7   :  { %5201 = vst [vmem:[#allocation7_spill] sm:$0xff] %v4689_v57  ;;  %v2423_v24 = vand.u32 4294901760, %v4689_v57  ;;  %v2490_v20 = vand.u32 4294901760, %v2489_v35 }
 0x2d9   :  { %v2481_v31 = vsub.f32 %v4689_v57, %v2423_v24 }
 0x2db   :  { %v4697_v48 = vpop.f32.mrf.mxu2  ;;  %v2482_v34 = vand.u32 4294901760, %v2481_v31  ;;  %v2279_v54 = vpop.f32.mrf.mxu0 }
 0x2dc   :  { %v2167_v36 = vpop.f32.mrf.mxu1  ;;  %v4699_v27 = vpop.f32.mrf.mxu3 }
 0x2dd   :  { %v4702_v42 = vadd.f32 %v2167_v36, %v2134_v26  ;;  %v2483_v2 = vsub.f32 %v2481_v31, %v2482_v34  ;;  %v5208_v36 = vld [vmem:[#allocation16_spill] sm:$0xff] }
 0x2df   :  { %5204 = vst [vmem:[#allocation10_spill] sm:$0xff] %v4702_v42  ;;  %v2421_v14 = vand.u32 4294901760, %v4702_v42  ;;  %v2484_v9 = vand.u32 4294901760, %v2483_v2 }
 0x2e1   :  { %v2475_v25 = vsub.f32 %v4702_v42, %v2421_v14  ;;  %2422 = vmatpush.msra.mxu0 %v2421_v14  ;;  %2573 = vmatpush.msra.mxu3 %v2421_v14  ;;  %v5217_v42 = vld [vmem:[#allocation14_spill] sm:$0xff] }
 0x2e3   :  { %v4709_v60 = vpop.f32.mrf.mxu2  ;;  %2424 = vmatpush.msra.mxu0 %v2423_v24  ;;  %2529 = vmatpush.msra.mxu2 %v2475_v25  ;;  %v2476_v44 = vand.u32 4294901760, %v2475_v25  ;;  %v2284_v26 = vpop.f32.mrf.mxu0 }
 0x2e4   :  { %2575 = vmatpush.msra.mxu3 %v2423_v24  ;;  %v2251_v13 = vpop.f32.mrf.mxu3  ;;  %v2318_v41 = vpop.f32.mrf.mxu1 }
 0x2e5   :  { %2426 = vmatpush.msra.mxu0 %v2425_v8  ;;  %2532 = vmatpush.msra.mxu2 %v2481_v31  ;;  %v2477_v5 = vsub.f32 %v2475_v25, %v2476_v44  ;;  %v5209_v31 = vld [vmem:[#allocation3_spill] sm:$0xff]  ;;  %v5210_v25 = vld [vmem:[#allocation13_spill] sm:$0xff] }
 0x2e6   :  { %2577 = vmatpush.msra.mxu3 %v2425_v8 }
 0x2e7   :  { %2428 = vmatpush.msra.mxu0 %v2427_v10  ;;  %2535 = vmatpush.msra.mxu2 %v2487_v4  ;;  %v2478_v39 = vand.u32 4294901760, %v2477_v5  ;;  %v5213_v5 = vld [vmem:[#allocation9_spill] sm:$0xff] }
 0x2e8   :  { %2579 = vmatpush.msra.mxu3 %v2427_v10  ;;  %2434 = vmatmul.f32.vlgmr.msra.gmra.mxu0 %v5205_v30 }
 0x2e9   :  { %2620 = vmatpush.msrb.mxu0 %v2476_v44  ;;  %2479 = vmatpush.msra.mxu1 %v2478_v39  ;;  %v5211_v44 = vld [vmem:[#allocation11_spill] sm:$0xff] }
 0x2ea   :  { %2538 = vmatpush.msra.mxu2 %v2493_v11  ;;  %2583 = vmatmul.f32.vlgmr.msra.gmra.mxu3 %v5206_v32 }
 0x2eb   :  { %2624 = vmatpush.msrb.mxu0 %v2482_v34  ;;  %v2360_v18 = vpop.f32.mrf.mxu2  ;;  %2485 = vmatpush.msra.mxu1 %v2484_v9  ;;  %v2289_v2 = vpop.f32.mrf.mxu0  ;;  %v5215_v9 = vld [vmem:[#allocation15_spill] sm:$0xff] }
 0x2ec   :  { %v2255_v7 = vpop.f32.mrf.mxu3  ;;  %2541 = vmatmul.f32.vlgmr.msra.gmra.mxu2 %v5207_v29  ;;  %v2324_v4 = vpop.f32.mrf.mxu1 }
 0x2ed   :  { %2628 = vmatpush.msrb.mxu0 %v2488_v45  ;;  %2491 = vmatpush.msra.mxu1 %v2490_v20  ;;  %v5212_v45 = vld [vmem:[#allocation20_spill] sm:$0xff] }
 0x2ef   :  { %2632 = vmatpush.msrb.mxu0 %v2494_v3  ;;  %2497 = vmatpush.msra.mxu1 %v2496_v37  ;;  %v5214_v3 = vld [vmem:[#allocation17_spill] sm:$0xff] }
 0x2f0   :  { %2442 = vmatmul.f32.gmra.mxu0 %v5208_v36  ;;  %2499 = vmatmul.f32.vlgmr.msra.gmra.mxu1 %v5209_v31 }
 0x2f1   :  { %2663 = vmatpush.msrb.mxu1 %v2421_v14  ;;  %v2210_v14 = vadd.f32 %v4697_v48, %v4022_v6 }
 0x2f2   :  { %2589 = vmatmul.f32.gmra.mxu3 %v5210_v25 }
 0x2f3   :  { %2665 = vmatpush.msrb.mxu1 %v2423_v24  ;;  %v2364_v11 = vpop.f32.mrf.mxu2  ;;  %v2202_v24 = vadd.f32 %v4685_v38, %v4020_v1  ;;  %v2252_v46 = vadd.f32 %v2251_v13, %v2210_v14  ;;  %v2218_v1 = vadd.f32 %v4709_v60, %v5200_v0  ;;  %v2294_v14 = vpop.f32.mrf.mxu0 }
 0x2f4   :  { %v2394_v34 = vpop.f32.mrf.mxu3  ;;  %2546 = vmatmul.f32.gmra.mxu2 %v5211_v44  ;;  %v2330_v39 = vpop.f32.mrf.mxu1 }
 0x2f5   :  { %2667 = vmatpush.msrb.mxu1 %v2425_v8  ;;  %v2248_v20 = vadd.f32 %v4699_v27, %v2202_v24  ;;  %v2290_v37 = vadd.f32 %v2289_v2, %v2252_v46  ;;  %v5219_v27 = vld [vmem:[#allocation19_spill] sm:$0xff]  ;;  %v2256_v2 = vadd.f32 %v2255_v7, %v2218_v1 }
 0x2f7   :  { %2669 = vmatpush.msrb.mxu1 %v2427_v10  ;;  %v2194_v10 = vadd.f32 %v4679_v33, %v4029_v17  ;;  %v2285_v48 = vadd.f32 %v2284_v26, %v2248_v20  ;;  %v2331_v57 = vadd.f32 %v2330_v39, %v2290_v37  ;;  %v5220_v20 = vld [vmem:[#allocation18_spill] sm:$0xff] }
 0x2f8   :  { %2450 = vmatmul.f32.gmra.mxu0 %v5212_v45  ;;  %2503 = vmatmul.f32.gmra.mxu1 %v5213_v5 }
 0x2f9   :  { %v2244_v6 = vadd.f32 %v4687_v12, %v2194_v10  ;;  %v2325_v13 = vadd.f32 %v2324_v4, %v2285_v48  ;;  %v2295_v12 = vadd.f32 %v2294_v14, %v2256_v2 }
 0x2fa   :  { %2595 = vmatmul.f32.gmra.mxu3 %v5214_v3 }
 0x2fb   :  { %v2368_v8 = vpop.f32.mrf.mxu2  ;;  %v2280_v38 = vadd.f32 %v2279_v54, %v2244_v6  ;;  %v2365_v46 = vadd.f32 %v2364_v11, %v2325_v13 }
 0x2fc   :  { %v2398_v35 = vpop.f32.mrf.mxu3  ;;  %2551 = vmatmul.f32.gmra.mxu2 %v5215_v9  ;;  %v2369_v17 = vadd.f32 %v2368_v8, %v2331_v57  ;;  %v2336_v63 = vpop.f32.mrf.mxu1 }
 0x2fd   :  { %v2319_v24 = vadd.f32 %v2318_v41, %v2280_v38  ;;  %v4738_v39 = vadd.f32 %v2398_v35, %v2365_v46  ;;  %v2337_v0 = vadd.f32 %v2336_v63, %v2295_v12  ;;  %v5222_v12 = vld [vmem:[#allocation24_spill] sm:$0xff] }
 0x2ff   :  { %v2361_v26 = vadd.f32 %v2360_v18, %v2319_v24  ;;  %v2703_v41 = vand.u32 4294901760, %v4738_v39 }
 0x300   :  { %2458 = vmatmul.f32.gmra.mxu0 %v5216_v55  ;;  %2507 = vmatmul.f32.gmra.mxu1 %v5217_v42 }
 0x301   :  { %v4742_v57 = vadd.f32 %v2394_v34, %v2361_v26  ;;  %v2765_v63 = vsub.f32 %v4738_v39, %v2703_v41 }
 0x302   :  { %2601 = vmatmul.f32.gmra.mxu3 %v5218_v21 }
 0x303   :  { %v2372_v10 = vpop.f32.mrf.mxu2  ;;  %v2705_v18 = vand.u32 4294901760, %v4742_v57  ;;  %v2766_v48 = vand.u32 4294901760, %v2765_v63 }
 0x304   :  { %v2402_v33 = vpop.f32.mrf.mxu3  ;;  %2556 = vmatmul.f32.gmra.mxu2 %v5219_v27  ;;  %v2373_v54 = vadd.f32 %v2372_v10, %v2337_v0 }
 0x305   :  { %v4736_v23 = vadd.f32 %v2402_v33, %v2369_v17  ;;  %v2771_v8 = vsub.f32 %v4742_v57, %v2705_v18  ;;  %v2767_v17 = vsub.f32 %v2765_v63, %v2766_v48 }
 0x307   :  { %v2701_v60 = vand.u32 4294901760, %v4736_v23  ;;  %v2772_v13 = vand.u32 4294901760, %v2771_v8  ;;  %v2768_v24 = vand.u32 4294901760, %v2767_v17 }
 0x308   :  { %2511 = vmatmul.f32.gmra.mxu1 %v5220_v20  ;;  %2634 = vmatmul.f32.vlgmr.msrb.gmra.mxu0 %v5209_v31 }
 0x309   :  { %v2759_v11 = vsub.f32 %v4736_v23, %v2701_v60  ;;  %v2773_v2 = vsub.f32 %v2771_v8, %v2772_v13 }
 0x30b   :  { %v2760_v37 = vand.u32 4294901760, %v2759_v11  ;;  %v2774_v46 = vand.u32 4294901760, %v2773_v2 }
 0x30c   :  { %v2406_v7 = vpop.f32.mrf.mxu3 }
 0x30d   :  { %v4746_v4 = vadd.f32 %v2406_v7, %v2373_v54  ;;  %v2761_v38 = vsub.f32 %v2759_v11, %v2760_v37 }
 0x30f   :  { %v2699_v35 = vand.u32 4294901760, %v4746_v4  ;;  %v2762_v33 = vand.u32 4294901760, %v2761_v38  ;;  %v5223_v38 = vld [vmem:[#allocation25_spill] sm:$0xff] }
 0x310   :  { %2638 = vmatmul.f32.gmra.mxu0 %v5213_v5  ;;  %2671 = vmatmul.f32.vlgmr.msrb.gmra.mxu1 %v5209_v31 }
 0x311   :  { %v2753_v34 = vsub.f32 %v4746_v4, %v2699_v35  ;;  %2700 = vmatpush.msrb.mxu2 %v2699_v35  ;;  %2851 = vmatpush.msra.mxu1 %v2699_v35 }
 0x313   :  { %2702 = vmatpush.msrb.mxu2 %v2701_v60  ;;  %2807 = vmatpush.msra.mxu0 %v2753_v34  ;;  %v2754_v6 = vand.u32 4294901760, %v2753_v34 }
 0x314   :  { %2853 = vmatpush.msra.mxu1 %v2701_v60 }
 0x315   :  { %2704 = vmatpush.msrb.mxu2 %v2703_v41  ;;  %2810 = vmatpush.msra.mxu0 %v2759_v11  ;;  %v2755_v1 = vsub.f32 %v2753_v34, %v2754_v6 }
 0x316   :  { %2855 = vmatpush.msra.mxu1 %v2703_v41 }
 0x317   :  { %2706 = vmatpush.msrb.mxu2 %v2705_v18  ;;  %2813 = vmatpush.msra.mxu0 %v2765_v63  ;;  %v2756_v14 = vand.u32 4294901760, %v2755_v1 }
 0x318   :  { %2857 = vmatpush.msra.mxu1 %v2705_v18  ;;  %2642 = vmatmul.f32.gmra.mxu0 %v5217_v42 }
 0x319   :  { %2675 = vmatmul.f32.gmra.mxu1 %v5213_v5  ;;  %2712 = vmatmul.f32.vlgmr.msrb.gmra.mxu2 %v5205_v30 }
 0x31a   :  { %2898 = vmatpush.msra.mxu2 %v2754_v6  ;;  %2757 = vmatpush.msrb.mxu3 %v2756_v14  ;;  %v5224_v14 = vld [vmem:[#allocation26_spill] sm:$0xff] }
 0x31b   :  { %2816 = vmatpush.msra.mxu0 %v2771_v8 }
 0x31c   :  { %2902 = vmatpush.msra.mxu2 %v2760_v37  ;;  %2763 = vmatpush.msrb.mxu3 %v2762_v33 }
 0x31e   :  { %2906 = vmatpush.msra.mxu2 %v2766_v48  ;;  %2769 = vmatpush.msrb.mxu3 %v2768_v24 }
 0x320   :  { %2910 = vmatpush.msra.mxu2 %v2772_v13  ;;  %2775 = vmatpush.msrb.mxu3 %v2774_v46 }
 0x321   :  { %2646 = vmatmul.f32.gmra.mxu0 %v5220_v20  ;;  %2679 = vmatmul.f32.gmra.mxu1 %v5217_v42 }
 0x322   :  { %2720 = vmatmul.f32.gmra.mxu2 %v5208_v36  ;;  %2777 = vmatmul.f32.vlgmr.msrb.gmra.mxu3 %v5209_v31 }
 0x323   :  { %2941 = vmatpush.msra.mxu3 %v2699_v35 }
 0x325   :  { %2943 = vmatpush.msra.mxu3 %v2701_v60 }
 0x327   :  { %2945 = vmatpush.msra.mxu3 %v2703_v41 }
 0x329   :  { %2947 = vmatpush.msra.mxu3 %v2705_v18  ;;  %2683 = vmatmul.f32.gmra.mxu1 %v5220_v20 }
 0x32a   :  { %2728 = vmatmul.f32.gmra.mxu2 %v5212_v45  ;;  %2781 = vmatmul.f32.gmra.mxu3 %v5213_v5 }
 0x32b   :  { %2819 = vmatmul.f32.vlgmr.msra.gmra.mxu0 %v5207_v29 }
 0x331   :  { %2861 = vmatmul.f32.vlgmr.msra.gmra.mxu1 %v5206_v32 }
 0x332   :  { %2736 = vmatmul.f32.gmra.mxu2 %v5216_v55  ;;  %2785 = vmatmul.f32.gmra.mxu3 %v5217_v42 }
 0x333   :  { %2824 = vmatmul.f32.gmra.mxu0 %v5211_v44 }
 0x339   :  { %2867 = vmatmul.f32.gmra.mxu1 %v5210_v25 }
 0x33a   :  { %2789 = vmatmul.f32.gmra.mxu3 %v5220_v20  ;;  %2912 = vmatmul.f32.vlgmr.msra.gmra.mxu2 %v5209_v31 }
 0x33b   :  { %2829 = vmatmul.f32.gmra.mxu0 %v5215_v9 }
 0x341   :  { %2873 = vmatmul.f32.gmra.mxu1 %v5214_v3 }
 0x342   :  { %2916 = vmatmul.f32.gmra.mxu2 %v5213_v5  ;;  %2949 = vmatmul.f32.vlgmr.msra.gmra.mxu3 %v5209_v31 }
 0x343   :  { %2834 = vmatmul.f32.gmra.mxu0 %v5219_v27  ;;  %v5221_v27 = vld [vmem:[#allocation23_spill] sm:$0xff] }
 0x349   :  { %2879 = vmatmul.f32.gmra.mxu1 %v5218_v21 }
 0x34a   :  { %2920 = vmatmul.f32.gmra.mxu2 %v5217_v42  ;;  %2953 = vmatmul.f32.gmra.mxu3 %v5213_v5 }
 0x352   :  { %2924 = vmatmul.f32.gmra.mxu2 %v5220_v20  ;;  %2957 = vmatmul.f32.gmra.mxu3 %v5217_v42 }
 0x35a   :  { %2961 = vmatmul.f32.gmra.mxu3 %v5220_v20 }
 0x365   :  { %v2435_v55 = vpop.f32.mrf.mxu0 }
 0x366   :  { %v2436_v5 = vadd.f32 %v2435_v55, %v5221_v27 }
 0x36d   :  { %v2443_v30 = vpop.f32.mrf.mxu0  ;;  %v2500_v32 = vpop.f32.mrf.mxu1 }
 0x36e   :  { %v2584_v45 = vpop.f32.mrf.mxu3  ;;  %v2444_v26 = vadd.f32 %v2443_v30, %v5222_v12  ;;  %v2501_v0 = vadd.f32 %v2500_v32, %v2436_v5 }
 0x36f   :  { %v2542_v31 = vpop.f32.mrf.mxu2 }
 0x370   :  { %v2543_v41 = vadd.f32 %v2542_v31, %v2501_v0 }
 0x372   :  { %v2585_v18 = vadd.f32 %v2584_v45, %v2543_v41 }
 0x375   :  { %v2451_v29 = vpop.f32.mrf.mxu0  ;;  %v2504_v36 = vpop.f32.mrf.mxu1 }
 0x376   :  { %v2590_v10 = vpop.f32.mrf.mxu3  ;;  %v2505_v20 = vadd.f32 %v2504_v36, %v2444_v26  ;;  %v2452_v13 = vadd.f32 %v2451_v29, %v5223_v38 }
 0x377   :  { %v2547_v21 = vpop.f32.mrf.mxu2 }
 0x378   :  { %v2548_v7 = vadd.f32 %v2547_v21, %v2505_v20 }
 0x37a   :  { %v2591_v11 = vadd.f32 %v2590_v10, %v2548_v7 }
 0x37d   :  { %v2459_v25 = vpop.f32.mrf.mxu0  ;;  %v2508_v44 = vpop.f32.mrf.mxu1 }
 0x37e   :  { %v2596_v35 = vpop.f32.mrf.mxu3  ;;  %v2460_v17 = vadd.f32 %v2459_v25, %v5224_v14  ;;  %v2509_v2 = vadd.f32 %v2508_v44, %v2452_v13 }
 0x37f   :  { %v2552_v42 = vpop.f32.mrf.mxu2 }
 0x380   :  { %v2553_v31 = vadd.f32 %v2552_v42, %v2509_v2 }
 0x382   :  { %v2597_v26 = vadd.f32 %v2596_v35, %v2553_v31 }
 0x385   :  { %v2512_v3 = vpop.f32.mrf.mxu1  ;;  %v2635_v9 = vpop.f32.mrf.mxu0 }
 0x386   :  { %v2636_v34 = vadd.f32 %v2635_v9, %v2585_v18  ;;  %v2513_v24 = vadd.f32 %v2512_v3, %v2460_v17  ;;  %v2602_v30 = vpop.f32.mrf.mxu3 }
 0x387   :  { %v2557_v63 = vpop.f32.mrf.mxu2 }
 0x388   :  { %v2558_v45 = vadd.f32 %v2557_v63, %v2513_v24 }
 0x38a   :  { %v2603_v10 = vadd.f32 %v2602_v30, %v2558_v45 }
 0x38d   :  { %v2672_v60 = vpop.f32.mrf.mxu1  ;;  %v2639_v54 = vpop.f32.mrf.mxu0 }
 0x38e   :  { %v2640_v8 = vadd.f32 %v2639_v54, %v2591_v11  ;;  %v2673_v6 = vadd.f32 %v2672_v60, %v2636_v34 }
 0x395   :  { %v2643_v1 = vpop.f32.mrf.mxu0 }
 0x396   :  { %v2676_v37 = vpop.f32.mrf.mxu1  ;;  %v2644_v29 = vadd.f32 %v2643_v1, %v2597_v26 }
 0x397   :  { %v2677_v48 = vadd.f32 %v2676_v37, %v2640_v8 }
 0x399   :  { %v2965_v33 = vmax.f32 %v2673_v6, %v2677_v48 }
 0x39b   :  { %v2966_v46 = vrot.slane %v2965_v33, 4 }
 0x39c   :  { %v4789_v55 = vpop.f32.mrf.mxu2 }
 0x39d   :  { %v2967_v32 = vmax.f32 %v2965_v33, %v2966_v46 }
 0x39e   :  { %v2680_v36 = vpop.f32.mrf.mxu1  ;;  %v2647_v5 = vpop.f32.mrf.mxu0 }
 0x39f   :  { %v2968_v21 = vrot.slane %v2967_v32, 2  ;;  %v2648_v25 = vadd.f32 %v2647_v5, %v2603_v10  ;;  %v2681_v54 = vadd.f32 %v2680_v36, %v2644_v29 }
 0x3a1   :  { %v2969_v9 = vmax.f32 %v2967_v32, %v2968_v21 }
 0x3a3   :  { %v2970_v0 = vrot.slane %v2969_v9, 1 }
 0x3a5   :  { %v2971_v20 = vmax.f32 %v2969_v9, %v2970_v0  ;;  %v2721_v60 = vpop.f32.mrf.mxu2  ;;  %v2778_v44 = vpop.f32.mrf.mxu3 }
 0x3a6   :  { %v2684_v3 = vpop.f32.mrf.mxu1 }
 0x3a7   :  { %vm2979_vm1 = vcmp.ge.f32.partialorder %v2673_v6, %v2971_v20  ;;  %vm2981_vm6 = vcmp.ge.f32.partialorder %v2677_v48, %v2971_v20  ;;  %v2685_v41 = vadd.f32 %v2684_v3, %v2648_v25  ;;  %v2714_v25 = vadd.f32 %v4789_v55, %v5221_v27 }
 0x3a8   :  { %v2983_v7 = vsel %vm2979_vm1, %v4258_v40, 16  ;;  %v2985_v42 = vsel %vm2981_vm6, %v4263_v58, 16  ;;  %v2820_v30 = vpop.f32.mrf.mxu0  ;;  %v2722_v3 = vadd.f32 %v2721_v60, %v5222_v12 }
 0x3a9   :  { %vm2987_vm7 = vcmp.lt.s32.totalorder %v2983_v7, %v2985_v42  ;;  %v3021_v18 = vmax.f32 %v2681_v54, %v2685_v41 }
 0x3aa   :  { %v2988_v11 = vsel %vm2987_vm7, %v2983_v7, %v2985_v42  ;;  %v2779_v42 = vadd.f32 %v2778_v44, %v2714_v25 }
 0x3ab   :  { %v2989_v35 = vrot.slane %v2988_v11, 4  ;;  %v3022_v63 = vrot.slane %v3021_v18, 4 }
 0x3ac   :  { %v2821_v60 = vadd.f32 %v2820_v30, %v2779_v42 }
 0x3ad   :  { %vm2990_vm2 = vcmp.lt.s32.totalorder %v2988_v11, %v2989_v35  ;;  %v3023_v34 = vmax.f32 %v3021_v18, %v3022_v63  ;;  %v4793_v8 = vpop.f32.mrf.mxu2  ;;  %v2782_v37 = vpop.f32.mrf.mxu3 }
 0x3ae   :  { %v2991_v1 = vsel %vm2990_vm2, %v2988_v11, %v2989_v35  ;;  %v2862_v45 = vpop.f32.mrf.mxu1  ;;  %v2783_v18 = vadd.f32 %v2782_v37, %v2722_v3 }
 0x3af   :  { %v2992_v13 = vrot.slane %v2991_v1, 2  ;;  %v3024_v6 = vrot.slane %v3023_v34, 2 }
 0x3b0   :  { %v2825_v20 = vpop.f32.mrf.mxu0 }
 0x3b1   :  { %v3025_v48 = vmax.f32 %v3023_v34, %v3024_v6  ;;  %vm2993_vm8 = vcmp.lt.s32.totalorder %v2991_v1, %v2992_v13  ;;  %v2826_v44 = vadd.f32 %v2825_v20, %v2783_v18  ;;  %v5225_v34 = vmov 1.0  }
 0x3b2   :  { %v2994_v33 = vsel %vm2993_vm8, %v2991_v1, %v2992_v13 }
 0x3b3   :  { %v3026_v17 = vrot.slane %v3025_v48, 1  ;;  %v2995_v32 = vrot.slane %v2994_v33, 1 }
 0x3b5   :  { %v3027_v2 = vmax.f32 %v3025_v48, %v3026_v17  ;;  %v4795_v24 = vpop.f32.mrf.mxu2  ;;  %v4797_v46 = vpop.f32.mrf.mxu3  ;;  %vm2996_vm12 = vcmp.lt.s32.totalorder %v2994_v33, %v2995_v32  ;;  %v2863_v17 = vadd.f32 %v2862_v45, %v2821_v60 }
 0x3b6   :  { %v4803_v0 = vsel %vm2996_vm12, %v2994_v33, %v2995_v32 }
 0x3b7   :  { %vm3035_vm9 = vcmp.ge.f32.partialorder %v2681_v54, %v3027_v2  ;;  %vm3037_vm10 = vcmp.ge.f32.partialorder %v2685_v41, %v3027_v2  ;;  %vm3011_vm15 = vcmp.eq.s32.totalorder %v4263_v58, %v4803_v0  ;;  %v2868_v41 = vpop.f32.mrf.mxu1  ;;  %vm3009_vm0 = vcmp.eq.s32.totalorder %v4258_v40, %v4803_v0 }
 0x3b8   :  { %v3039_v36 = vsel %vm3035_vm9, %v4258_v40, 16  ;;  %v3041_v31 = vsel %vm3037_vm10, %v4263_v58, 16  ;;  %v4816_v11 = vsel %vm3011_vm15, 1.0, %v5195_v22  ;;  %v4824_v12 = vsel %vm3009_vm0, 1.0, %v5195_v22  ;;  %v2830_v2 = vpop.f32.mrf.mxu0 }
 0x3b9   :  { %vm3043_vm11 = vcmp.lt.s32.totalorder %v3039_v36, %v3041_v31  ;;  %v3155_v55 = vsub.f32 %v4816_v11, %v4816_v11  ;;  %v3161_v48 = vsub.f32 %v4824_v12, %v4824_v12  ;;  %v2869_v33 = vadd.f32 %v2868_v41, %v2826_v44 }
 0x3ba   :  { %v3044_v21 = vsel %vm3043_vm11, %v3039_v36, %v3041_v31 }
 0x3bb   :  { %v3045_v9 = vrot.slane %v3044_v21, 4  ;;  %v3156_v36 = vand.u32 4294901760, %v3155_v55  ;;  %v3162_v20 = vand.u32 4294901760, %v3161_v48 }
 0x3bd   :  { %vm3046_vm13 = vcmp.lt.s32.totalorder %v3044_v21, %v3045_v9  ;;  %v4801_v5 = vpop.f32.mrf.mxu3  ;;  %v2913_v26 = vpop.f32.mrf.mxu2  ;;  %v3157_v41 = vsub.f32 %v3155_v55, %v3156_v36  ;;  %v3163_v18 = vsub.f32 %v3161_v48, %v3162_v20 }
 0x3be   :  { %v3047_v10 = vsel %vm3046_vm13, %v3044_v21, %v3045_v9  ;;  %v2914_v31 = vadd.f32 %v2913_v26, %v2863_v17 }
 0x3bf   :  { %v3048_v29 = vrot.slane %v3047_v10, 2  ;;  %v2874_v45 = vpop.f32.mrf.mxu1 }
 0x3c0   :  { %v2835_v17 = vpop.f32.mrf.mxu0 }
 0x3c1   :  { %vm3049_vm14 = vcmp.lt.s32.totalorder %v3047_v10, %v3048_v29 }
 0x3c2   :  { %v3050_v54 = vsel %vm3049_vm14, %v3047_v10, %v3048_v29 }
 0x3c3   :  { %v3051_v7 = vrot.slane %v3050_v54, 1 }
 0x3c5   :  { %v2917_v35 = vpop.f32.mrf.mxu2  ;;  %v2950_v63 = vpop.f32.mrf.mxu3  ;;  %vm3052_vm3 = vcmp.lt.s32.totalorder %v3050_v54, %v3051_v7 }
 0x3c6   :  { %v4818_v27 = vsel %vm3052_vm3, %v3050_v54, %v3051_v7  ;;  %v2918_v21 = vadd.f32 %v2917_v35, %v2869_v33  ;;  %v2951_v25 = vadd.f32 %v2950_v63, %v2914_v31  ;;  %v2730_v35 = vadd.f32 %v4793_v8, %v5223_v38 }
 0x3c7   :  { %vm3067_vm4 = vcmp.eq.s32.totalorder %v4263_v58, %v4818_v27  ;;  %vm3065_vm5 = vcmp.eq.s32.totalorder %v4258_v40, %v4818_v27  ;;  %v2738_v63 = vadd.f32 %v4795_v24, %v5224_v14  ;;  %v3164_v33 = vand.u32 4294901760, %v3163_v18  ;;  %v2880_v8 = vpop.f32.mrf.mxu1 }
 0x3c8   :  { %3794 = vmatpush.msk.msrb.mxu0 %vm3067_vm4, %v5225_v34  ;;  %3798 = vmatpush.msk.msrb.mxu3 %vm3067_vm4, %v5225_v34  ;;  %v4844_v37 = vsel %vm3067_vm4, 1.0, %v5195_v22  ;;  %v4850_v1 = vsel %vm3065_vm5, 1.0, %v5195_v22  ;;  %v2787_v44 = vadd.f32 %v4797_v46, %v2730_v35 }
 0x3c9   :  { %v3143_v13 = vsub.f32 %v4844_v37, %v4844_v37  ;;  %v3149_v6 = vsub.f32 %v4850_v1, %v4850_v1 }
 0x3ca   :  { %3795 = vmatpush.msk.msrb.mxu0 %vm3065_vm5, %v5225_v34  ;;  %3799 = vmatpush.msk.msrb.mxu3 %vm3065_vm5, %v5225_v34  ;;  %v2831_v14 = vadd.f32 %v2830_v2, %v2787_v44 }
 0x3cb   :  { %3197 = vmatpush.msrb.mxu2 %v3143_v13  ;;  %v3144_v30 = vand.u32 4294901760, %v3143_v13  ;;  %v3150_v32 = vand.u32 4294901760, %v3149_v6 }
 0x3cc   :  { %3796 = vmatpush.msk.msrb.mxu0 %vm3011_vm15, %v5225_v34  ;;  %3800 = vmatpush.msk.msrb.mxu3 %vm3011_vm15, %v5225_v34 }
 0x3cd   :  { %v2954_v9 = vpop.f32.mrf.mxu3  ;;  %3200 = vmatpush.msrb.mxu2 %v3149_v6  ;;  %v3145_v10 = vsub.f32 %v3143_v13, %v3144_v30  ;;  %v3151_v29 = vsub.f32 %v3149_v6, %v3150_v32  ;;  %v2921_v26 = vpop.f32.mrf.mxu2  ;;  %v2791_v13 = vadd.f32 %v4801_v5, %v2738_v63  ;;  %v2875_v5 = vadd.f32 %v2874_v45, %v2831_v14 }
 0x3ce   :  { %v2955_v3 = vadd.f32 %v2954_v9, %v2918_v21  ;;  %3797 = vmatpush.msk.msrb.mxu0 %vm3009_vm0, %v5225_v34  ;;  %3801 = vmatpush.msk.msrb.mxu3 %vm3009_vm0, %v5225_v34 }
 0x3cf   :  { %3203 = vmatpush.msrb.mxu2 %v3155_v55  ;;  %v3146_v54 = vand.u32 4294901760, %v3145_v10  ;;  %3102 = vmatmul.f32.vlgmr.msrb.gmra.mxu0 %v4381_v47  ;;  %v3152_v42 = vand.u32 4294901760, %v3151_v29  ;;  %v3158_v55 = vand.u32 4294901760, %v3157_v41  ;;  %v2836_v24 = vadd.f32 %v2835_v17, %v2791_v13 }
 0x3d0   :  { %3288 = vmatpush.msra.mxu0 %v3144_v30  ;;  %v2972_v7 = vmax.f32 %v2951_v25, %v2955_v3  ;;  %3251 = vmatmul.f32.vlgmr.msrb.gmra.mxu3 %v4300_v49  ;;  %v2922_v2 = vadd.f32 %v2921_v26, %v2875_v5 }
 0x3d1   :  { %3147 = vmatpush.msrb.mxu1 %v3146_v54  ;;  %3206 = vmatpush.msrb.mxu2 %v3161_v48 }
 0x3d2   :  { %v2973_v60 = vrot.slane %v2972_v7, 4  ;;  %3292 = vmatpush.msra.mxu0 %v3150_v32  ;;  %3209 = vmatmul.f32.vlgmr.msrb.gmra.mxu2 %v4288_v16  ;;  %v2881_v32 = vadd.f32 %v2880_v8, %v2836_v24 }
 0x3d3   :  { %3153 = vmatpush.msrb.mxu1 %v3152_v42 }
 0x3d4   :  { %v2974_v6 = vmax.f32 %v2972_v7, %v2973_v60  ;;  %3296 = vmatpush.msra.mxu0 %v3156_v36 }
 0x3d5   :  { %v2958_v48 = vpop.f32.mrf.mxu3  ;;  %3159 = vmatpush.msrb.mxu1 %v3158_v55  ;;  %v2925_v46 = vpop.f32.mrf.mxu2 }
 0x3d6   :  { %v2975_v38 = vrot.slane %v2974_v6, 2  ;;  %3300 = vmatpush.msra.mxu0 %v3162_v20  ;;  %v2926_v21 = vadd.f32 %v2925_v46, %v2881_v32  ;;  %v2959_v45 = vadd.f32 %v2958_v48, %v2922_v2  ;;  %v5226_v48 = vld [vmem:[#allocation27_spill] sm:$0xff] }
 0x3d7   :  { %3165 = vmatpush.msrb.mxu1 %v3164_v33  ;;  %3110 = vmatmul.f32.gmra.mxu0 %v4428_v53 }
 0x3d8   :  { %v2976_v30 = vmax.f32 %v2974_v6, %v2975_v38  ;;  %3167 = vmatmul.f32.vlgmr.msrb.gmra.mxu1 %v4282_v51  ;;  %3257 = vmatmul.f32.gmra.mxu3 %v4384_v50 }
 0x3d9   :  { %3802 = vmatpush.msk.msra.mxu1 %vm3067_vm4, %v5225_v34 }
 0x3da   :  { %v2977_v36 = vrot.slane %v2976_v30, 1  ;;  %3214 = vmatmul.f32.gmra.mxu2 %v4326_v28 }
 0x3db   :  { %3803 = vmatpush.msk.msra.mxu1 %vm3065_vm5, %v5225_v34 }
 0x3dc   :  { %v2978_v31 = vmax.f32 %v2976_v30, %v2977_v36 }
 0x3dd   :  { %v2962_v9 = vpop.f32.mrf.mxu3  ;;  %3804 = vmatpush.msk.msra.mxu1 %vm3011_vm15, %v5225_v34 }
 0x3de   :  { %vm2980_vm1 = vcmp.ge.f32.partialorder %v2951_v25, %v2978_v31  ;;  %vm2982_vm6 = vcmp.ge.f32.partialorder %v2955_v3, %v2978_v31  ;;  %v2963_v10 = vadd.f32 %v2962_v9, %v2926_v21 }
 0x3df   :  { %v2984_v29 = vsel %vm2980_vm1, %v4258_v40, 16  ;;  %v2986_v20 = vsel %vm2982_vm6, %v4263_v58, 16  ;;  %3805 = vmatpush.msk.msra.mxu1 %vm3009_vm0, %v5225_v34  ;;  %3118 = vmatmul.f32.gmra.mxu0 %v4453_v59  ;;  %vm3690_vm1 = vcmask 7168  }
 0x3e0   :  { %vm2998_vm7 = vcmp.lt.s32.totalorder %v2984_v29, %v2986_v20  ;;  %v3028_v27 = vmax.f32 %v2959_v45, %v2963_v10  ;;  %3171 = vmatmul.f32.gmra.mxu1 %v4302_v15  ;;  %3263 = vmatmul.f32.gmra.mxu3 %v4432_v43 }
 0x3e1   :  { %v2999_v26 = vsel %vm2998_vm7, %v2984_v29, %v2986_v20 }
 0x3e2   :  { %v3000_v25 = vrot.slane %v2999_v26, 4  ;;  %v3029_v3 = vrot.slane %v3028_v27, 4  ;;  %3219 = vmatmul.f32.gmra.mxu2 %v4417_v62 }
 0x3e4   :  { %vm3001_vm2 = vcmp.lt.s32.totalorder %v2999_v26, %v3000_v25  ;;  %v3030_v54 = vmax.f32 %v3028_v27, %v3029_v3 }
 0x3e5   :  { %v3002_v41 = vsel %vm3001_vm2, %v2999_v26, %v3000_v25 }
 0x3e6   :  { %v3003_v7 = vrot.slane %v3002_v41, 2  ;;  %v3031_v42 = vrot.slane %v3030_v54, 2 }
 0x3e7   :  { %3126 = vmatmul.f32.gmra.mxu0 %v4491_v52 }
 0x3e8   :  { %vm3004_vm8 = vcmp.lt.s32.totalorder %v3002_v41, %v3003_v7  ;;  %v3032_v0 = vmax.f32 %v3030_v54, %v3031_v42  ;;  %3175 = vmatmul.f32.gmra.mxu1 %v4387_v19  ;;  %3269 = vmatmul.f32.gmra.mxu3 %v4456_v61 }
 0x3e9   :  { %v3005_v18 = vsel %vm3004_vm8, %v3002_v41, %v3003_v7 }
 0x3ea   :  { %v3033_v35 = vrot.slane %v3032_v0, 1  ;;  %v3006_v63 = vrot.slane %v3005_v18, 1  ;;  %3224 = vmatmul.f32.gmra.mxu2 %v4440_v56 }
 0x3ec   :  { %v3034_v60 = vmax.f32 %v3032_v0, %v3033_v35  ;;  %vm3007_vm9 = vcmp.lt.s32.totalorder %v3005_v18, %v3006_v63 }
 0x3ed   :  { %v4921_v55 = vsel %vm3007_vm9, %v3005_v18, %v3006_v63 }
 0x3ee   :  { %vm3036_vm10 = vcmp.ge.f32.partialorder %v2959_v45, %v3034_v60  ;;  %vm3038_vm11 = vcmp.ge.f32.partialorder %v2963_v10, %v3034_v60  ;;  %vm3012_vm12 = vcmp.eq.s32.totalorder %v4263_v58, %v4921_v55  ;;  %vm3010_vm13 = vcmp.eq.s32.totalorder %v4258_v40, %v4921_v55 }
 0x3ef   :  { %v3040_v44 = vsel %vm3036_vm10, %v4258_v40, 16  ;;  %v3042_v13 = vsel %vm3038_vm11, %v4263_v58, 16  ;;  %v3789_v6 = vsel %vm3012_vm12, 1.0, %v5195_v22  ;;  %v3787_v17 = vsel %vm3010_vm13, 1.0, %v5195_v22  ;;  %3302 = vmatmul.f32.vlgmr.msra.gmra.mxu0 %v4282_v51 }
 0x3f0   :  { %vm3054_vm14 = vcmp.lt.s32.totalorder %v3040_v44, %v3042_v13  ;;  %3179 = vmatmul.f32.gmra.mxu1 %v5226_v48  ;;  %v3645_v33 = vadd.f32 %v3789_v6, %v4816_v11  ;;  %v3642_v8 = vadd.f32 %v3787_v17, %v4824_v12  ;;  %v3433_v32 = vsub.f32 %v3789_v6, %v3789_v6 }
 0x3f1   :  { %v3055_v38 = vsel %vm3054_vm14, %v3040_v44, %v3042_v13  ;;  %v3439_v12 = vsub.f32 %v3787_v17, %v3787_v17 }
 0x3f2   :  { %v3056_v14 = vrot.slane %v3055_v38, 4  ;;  %3646 = vadd.xlane.f32.xlu1 %v3645_v33  ;;  %3643 = vadd.xlane.f32.xlu0 %v3642_v8  ;;  %v3434_v29 = vand.u32 4294901760, %v3433_v32 }
 0x3f3   :  { %v3440_v20 = vand.u32 4294901760, %v3439_v12 }
 0x3f4   :  { %vm3057_vm15 = vcmp.lt.s32.totalorder %v3055_v38, %v3056_v14  ;;  %v3435_v26 = vsub.f32 %v3433_v32, %v3434_v29 }
 0x3f5   :  { %v3058_v24 = vsel %vm3057_vm15, %v3055_v38, %v3056_v14  ;;  %v3441_v3 = vsub.f32 %v3439_v12, %v3440_v20 }
 0x3f6   :  { %v3059_v30 = vrot.slane %v3058_v24, 2  ;;  %v3436_v54 = vand.u32 4294901760, %v3435_v26 }
 0x3f7   :  { %3306 = vmatmul.f32.gmra.mxu0 %v4302_v15  ;;  %v3442_v41 = vand.u32 4294901760, %v3441_v3 }
 0x3f8   :  { %vm3060_vm0 = vcmp.lt.s32.totalorder %v3058_v24, %v3059_v30  ;;  %3339 = vmatmul.f32.vlgmr.msra.gmra.mxu1 %v4282_v51 }
 0x3f9   :  { %v3061_v46 = vsel %vm3060_vm0, %v3058_v24, %v3059_v30 }
 0x3fa   :  { %v3062_v5 = vrot.slane %v3061_v46, 1 }
 0x3fc   :  { %vm3063_vm3 = vcmp.lt.s32.totalorder %v3061_v46, %v3062_v5 }
 0x3fd   :  { %v3064_v11 = vsel %vm3063_vm3, %v3061_v46, %v3062_v5 }
 0x3fe   :  { %vm3068_vm4 = vcmp.eq.s32.totalorder %v4263_v58, %v3064_v11  ;;  %vm3066_vm5 = vcmp.eq.s32.totalorder %v4258_v40, %v3064_v11  ;;  %v1875_v58 = vpop.xlane.xlu2 %1874 }
 0x3ff   :  { %3806 = vmatpush.msk.msra.mxu2 %vm3068_vm4, %v5225_v34  ;;  %3810 = vmatpush.msk.msrb.mxu1 %vm3068_vm4, %v5225_v34  ;;  %v3793_v36 = vsel %vm3068_vm4, 1.0, %v5195_v22  ;;  %v3791_v2 = vsel %vm3066_vm5, 1.0, %v5195_v22 }
 0x400   :  { %3343 = vmatmul.f32.gmra.mxu1 %v4302_v15  ;;  %v3421_v31 = vsub.f32 %v3793_v36, %v3793_v36  ;;  %v3651_v21 = vadd.f32 %v3793_v36, %v4844_v37  ;;  %v3427_v9 = vsub.f32 %v3791_v2, %v3791_v2  ;;  %v3648_v45 = vadd.f32 %v3791_v2, %v4850_v1 }
 0x401   :  { %3807 = vmatpush.msk.msra.mxu2 %vm3066_vm5, %v5225_v34  ;;  %3811 = vmatpush.msk.msrb.mxu1 %vm3066_vm5, %v5225_v34 }
 0x402   :  { %3475 = vmatpush.msrb.mxu0 %v3421_v31  ;;  %3652 = vadd.xlane.f32.xlu0 %v3651_v21  ;;  %v3422_v10 = vand.u32 4294901760, %v3421_v31  ;;  %v3428_v22 = vand.u32 4294901760, %v3427_v9 }
 0x403   :  { %3649 = vadd.xlane.f32.xlu2 %v3648_v45  ;;  %3808 = vmatpush.msk.msra.mxu2 %vm3012_vm12, %v5225_v34 }
 0x404   :  { %3812 = vmatpush.msk.msrb.mxu1 %vm3012_vm12, %v5225_v34  ;;  %3478 = vmatpush.msrb.mxu0 %v3427_v9  ;;  %v3423_v37 = vsub.f32 %v3421_v31, %v3422_v10  ;;  %v3429_v1 = vsub.f32 %v3427_v9, %v3428_v22 }
 0x405   :  { %3809 = vmatpush.msk.msra.mxu2 %vm3010_vm13, %v5225_v34  ;;  %3310 = vmatmul.f32.gmra.mxu0 %v4387_v19 }
 0x406   :  { %3813 = vmatpush.msk.msrb.mxu1 %vm3010_vm13, %v5225_v34  ;;  %3481 = vmatpush.msrb.mxu0 %v3433_v32  ;;  %v3424_v27 = vand.u32 4294901760, %v3423_v37  ;;  %v3430_v25 = vand.u32 4294901760, %v3429_v1 }
 0x407   :  { %3566 = vmatpush.msrb.mxu2 %v3422_v10 }
 0x408   :  { %3425 = vmatpush.msra.mxu3 %v3424_v27  ;;  %3484 = vmatpush.msrb.mxu0 %v3439_v12 }
 0x409   :  { %3570 = vmatpush.msrb.mxu2 %v3428_v22  ;;  %3347 = vmatmul.f32.gmra.mxu1 %v4387_v19 }
 0x40a   :  { %3431 = vmatpush.msra.mxu3 %v3430_v25  ;;  %3380 = vmatmul.f32.vlgmr.msra.gmra.mxu2 %v4381_v47  ;;  %v1884_v47 = vpop.xlane.xlu2 %1883 }
 0x40b   :  { %3574 = vmatpush.msrb.mxu2 %v3434_v29 }
 0x40c   :  { %3437 = vmatpush.msra.mxu3 %v3436_v54 }
 0x40d   :  { %3578 = vmatpush.msrb.mxu2 %v3440_v20  ;;  %3314 = vmatmul.f32.gmra.mxu0 %v5226_v48 }
 0x40e   :  { %3443 = vmatpush.msra.mxu3 %v3442_v41 }
 0x40f   :  { %3445 = vmatmul.f32.vlgmr.msra.gmra.mxu3 %v4282_v51 }
 0x410   :  { %3814 = vmatpush.msk.msrb.mxu3 %vm3068_vm4, %v5225_v34 }
 0x411   :  { %3351 = vmatmul.f32.gmra.mxu1 %v5226_v48 }
 0x412   :  { %3815 = vmatpush.msk.msrb.mxu3 %vm3066_vm5, %v5225_v34  ;;  %3388 = vmatmul.f32.gmra.mxu2 %v4428_v53 }
 0x414   :  { %3816 = vmatpush.msk.msrb.mxu3 %vm3012_vm12, %v5225_v34 }
 0x415   :  { %3487 = vmatmul.f32.vlgmr.msrb.gmra.mxu0 %v4288_v16  ;;  %v1881_v16 = vpop.xlane.xlu1 %1880 }
 0x416   :  { %3817 = vmatpush.msk.msrb.mxu3 %vm3010_vm13, %v5225_v34 }
 0x417   :  { %3449 = vmatmul.f32.gmra.mxu3 %v4302_v15 }
 0x419   :  { %3529 = vmatmul.f32.vlgmr.msrb.gmra.mxu1 %v4300_v49 }
 0x41a   :  { %3396 = vmatmul.f32.gmra.mxu2 %v4453_v59 }
 0x41d   :  { %3492 = vmatmul.f32.gmra.mxu0 %v4326_v28 }
 0x41f   :  { %3453 = vmatmul.f32.gmra.mxu3 %v4387_v19 }
 0x421   :  { %3535 = vmatmul.f32.gmra.mxu1 %v4384_v50  ;;  %v5024_v50 = vpop.xlane.xlu1 %1912 }
 0x422   :  { %3404 = vmatmul.f32.gmra.mxu2 %v4491_v52 }
 0x425   :  { %3497 = vmatmul.f32.gmra.mxu0 %v4417_v62 }
 0x427   :  { %3457 = vmatmul.f32.gmra.mxu3 %v5226_v48 }
 0x429   :  { %3541 = vmatmul.f32.gmra.mxu1 %v4432_v43  ;;  %v5028_v43 = vpop.xlane.xlu2 %1906 }
 0x42a   :  { %3580 = vmatmul.f32.vlgmr.msrb.gmra.mxu2 %v4282_v51 }
 0x42d   :  { %3502 = vmatmul.f32.gmra.mxu0 %v4440_v56 }
 0x42f   :  { %3617 = vmatmul.f32.vlgmr.msrb.gmra.mxu3 %v4282_v51  ;;  %v1878_v51 = vpop.xlane.xlu0 %1877 }
 0x431   :  { %3547 = vmatmul.f32.gmra.mxu1 %v4456_v61  ;;  %v5038_v63 = vpop.xlane.xlu2 %1915 }
 0x432   :  { %3584 = vmatmul.f32.gmra.mxu2 %v4302_v15 }
 0x437   :  { %3621 = vmatmul.f32.gmra.mxu3 %v4302_v15  ;;  %v5026_v15 = vpop.xlane.xlu0 %1909 }
 0x43a   :  { %3588 = vmatmul.f32.gmra.mxu2 %v4387_v19 }
 0x43f   :  { %3625 = vmatmul.f32.gmra.mxu3 %v4387_v19 }
 0x442   :  { %3592 = vmatmul.f32.gmra.mxu2 %v5226_v48 }
 0x447   :  { %3629 = vmatmul.f32.gmra.mxu3 %v5226_v48 }
 0x44c   :  { %v3103_v40 = vpop.f32.mrf.mxu0 }
 0x453   :  { %v3252_v0 = vpop.f32.mrf.mxu3 }
 0x454   :  { %v3111_v28 = vpop.f32.mrf.mxu0 }
 0x455   :  { %v3168_v49 = vpop.f32.mrf.mxu1  ;;  %v3210_v19 = vpop.f32.mrf.mxu2 }
 0x456   :  { %v3169_v42 = vadd.f32 %v3168_v49, %v3103_v40 }
 0x458   :  { %v3211_v18 = vadd.f32 %v3210_v19, %v3169_v42 }
 0x45a   :  { %v3253_v13 = vadd.f32 %v3252_v0, %v3211_v18 }
 0x45b   :  { %v3258_v6 = vpop.f32.mrf.mxu3 }
 0x45c   :  { %v3119_v53 = vpop.f32.mrf.mxu0 }
 0x45d   :  { %v3172_v62 = vpop.f32.mrf.mxu1  ;;  %v3215_v55 = vpop.f32.mrf.mxu2 }
 0x45e   :  { %v3173_v44 = vadd.f32 %v3172_v62, %v3111_v28 }
 0x460   :  { %v3216_v48 = vadd.f32 %v3215_v55, %v3173_v44 }
 0x462   :  { %v3259_v46 = vadd.f32 %v3258_v6, %v3216_v48 }
 0x463   :  { %v3264_v36 = vpop.f32.mrf.mxu3 }
 0x464   :  { %v3127_v34 = vpop.f32.mrf.mxu0 }
 0x465   :  { %v3647_v56 = vpop.xlane.xlu1 %3646  ;;  %v3176_v59 = vpop.f32.mrf.mxu1 }
 0x466   :  { %v3655_v61 = vadd.f32 %v3647_v56, %v1878_v51  ;;  %v3644_v52 = vpop.xlane.xlu0 %3643  ;;  %v3177_v11 = vadd.f32 %v3176_v59, %v3119_v53  ;;  %v3220_v32 = vpop.f32.mrf.mxu2 }
 0x467   :  { %v3654_v7 = vadd.f32 %v3644_v52, %v1875_v58 }
 0x468   :  { %3692 = vst.msk [vmem:[%s5111_s7 + $0x8] sm:$0xff] %vm3690_vm1, %v3655_v61  ;;  %v3221_v31 = vadd.f32 %v3220_v32, %v3177_v11  ;;  %v5228_v11 = vld [vmem:[#allocation5_spill] sm:$0xff] }
 0x469   :  { %3691 = vst.msk [vmem:[%s5111_s7] sm:$0xff] %vm3690_vm1, %v3654_v7 }
 0x46a   :  { %v3265_v45 = vadd.f32 %v3264_v36, %v3221_v31 }
 0x46b   :  { %v3270_v20 = vpop.f32.mrf.mxu3 }
 0x46c   :  { %v3303_v60 = vpop.f32.mrf.mxu0 }
 0x46d   :  { %v3180_v35 = vpop.f32.mrf.mxu1  ;;  %v3304_v17 = vadd.f32 %v3303_v60, %v3253_v13 }
 0x46e   :  { %v3181_v9 = vadd.f32 %v3180_v35, %v3127_v34  ;;  %v3225_v22 = vpop.f32.mrf.mxu2  ;;  %v5227_v35 = vld [vmem:[#allocation4_spill] sm:$0xff] }
 0x470   :  { %v3226_v37 = vadd.f32 %v3225_v22, %v3181_v9 }
 0x472   :  { %v3271_v26 = vadd.f32 %v3270_v20, %v3226_v37 }
 0x474   :  { %v3307_v5 = vpop.f32.mrf.mxu0 }
 0x475   :  { %v3653_v33 = vpop.xlane.xlu0 %3652  ;;  %v3340_v38 = vpop.f32.mrf.mxu1  ;;  %v3308_v12 = vadd.f32 %v3307_v5, %v3259_v46 }
 0x476   :  { %v3657_v8 = vadd.f32 %v3653_v33, %v1884_v47  ;;  %v3650_v14 = vpop.xlane.xlu2 %3649  ;;  %v3341_v24 = vadd.f32 %v3340_v38, %v3304_v17 }
 0x477   :  { %v3656_v30 = vadd.f32 %v3650_v14, %v1881_v16 }
 0x478   :  { %3694 = vst.msk [vmem:[%s5111_s7 + $0x18] sm:$0xff] %vm3690_vm1, %v3657_v8  ;;  %v3658_v60 = vsub.f32 %v3341_v24, %v5227_v35 }
 0x479   :  { %3693 = vst.msk [vmem:[%s5111_s7 + $0x10] sm:$0xff] %vm3690_vm1, %v3656_v30 }
 0x47a   :  { %3818 = vst [vmem:[%s5110_s6 + $0x40] sm:$0xff] %v3341_v24  ;;  %v3666_v48 = vmul.f32 %v3658_v60, %v3658_v60 }
 0x47d   :  { %v3344_v2 = vpop.f32.mrf.mxu1 }
 0x47e   :  { %v3345_v21 = vadd.f32 %v3344_v2, %v3308_v12 }
 0x480   :  { %3820 = vst [vmem:[%s5110_s6 + $0x50] sm:$0xff] %v3345_v21  ;;  %v3660_v24 = vsub.f32 %v3345_v21, %v5228_v11 }
 0x482   :  { %v3311_v10 = vpop.f32.mrf.mxu0  ;;  %v3668_v2 = vmul.f32 %v3660_v24, %v3660_v24 }
 0x483   :  { %v3312_v29 = vadd.f32 %v3311_v10, %v3265_v45 }
 0x486   :  { %v3348_v1 = vpop.f32.mrf.mxu1 }
 0x487   :  { %v3349_v27 = vadd.f32 %v3348_v1, %v3312_v29  ;;  %v5229_v1 = vld [vmem:[#allocation7_spill] sm:$0xff] }
 0x489   :  { %3822 = vst [vmem:[%s5110_s6 + $0x60] sm:$0xff] %v3349_v27  ;;  %v3662_v21 = vsub.f32 %v3349_v27, %v5229_v1 }
 0x48a   :  { %v3315_v25 = vpop.f32.mrf.mxu0 }
 0x48b   :  { %v3316_v3 = vadd.f32 %v3315_v25, %v3271_v26 }
 0x48d   :  { %v3381_v54 = vpop.f32.mrf.mxu2 }
 0x48e   :  { %v3352_v41 = vpop.f32.mrf.mxu1 }
 0x48f   :  { %v5057_v40 = vadd.f32 %v3352_v41, %v3316_v3 }
 0x491   :  { %3824 = vst [vmem:[%s5110_s6 + $0x70] sm:$0xff] %v5057_v40 }
 0x492   :  { %v3446_v58 = vpop.f32.mrf.mxu3  ;;  %v3488_v47 = vpop.f32.mrf.mxu0 }
 0x493   :  { %v3447_v19 = vadd.f32 %v3446_v58, %v3381_v54  ;;  %v3670_v54 = vmul.f32 %v3662_v21, %v3662_v21 }
 0x495   :  { %v3389_v16 = vpop.f32.mrf.mxu2  ;;  %v3489_v59 = vadd.f32 %v3488_v47, %v3447_v19 }
 0x496   :  { %v3530_v53 = vpop.f32.mrf.mxu1 }
 0x497   :  { %v3531_v7 = vadd.f32 %v3530_v53, %v3489_v59 }
 0x49a   :  { %v3450_v49 = vpop.f32.mrf.mxu3  ;;  %v3493_v61 = vpop.f32.mrf.mxu0 }
 0x49b   :  { %v3451_v34 = vadd.f32 %v3450_v49, %v3389_v16 }
 0x49d   :  { %v3397_v28 = vpop.f32.mrf.mxu2  ;;  %v3494_v44 = vadd.f32 %v3493_v61, %v3451_v34 }
 0x49e   :  { %v3536_v42 = vpop.f32.mrf.mxu1 }
 0x49f   :  { %v3537_v8 = vadd.f32 %v3536_v42, %v3494_v44 }
 0x4a2   :  { %v3454_v51 = vpop.f32.mrf.mxu3  ;;  %v3498_v17 = vpop.f32.mrf.mxu0 }
 0x4a3   :  { %v3455_v33 = vadd.f32 %v3454_v51, %v3397_v28  ;;  %v5230_v51 = vld [vmem:[#allocation10_spill] sm:$0xff] }
 0x4a4   :  { %v3664_v27 = vsub.f32 %v5057_v40, %v5230_v51 }
 0x4a5   :  { %v3405_v62 = vpop.f32.mrf.mxu2  ;;  %v3499_v12 = vadd.f32 %v3498_v17, %v3455_v33 }
 0x4a6   :  { %v3542_v5 = vpop.f32.mrf.mxu1  ;;  %v3672_v53 = vmul.f32 %v3664_v27, %v3664_v27 }
 0x4a7   :  { %v3543_v45 = vadd.f32 %v3542_v5, %v3499_v12 }
 0x4aa   :  { %v3458_v56 = vpop.f32.mrf.mxu3  ;;  %v3503_v10 = vpop.f32.mrf.mxu0 }
 0x4ab   :  { %v3459_v31 = vadd.f32 %v3458_v56, %v3405_v62 }
 0x4ad   :  { %v3581_v52 = vpop.f32.mrf.mxu2  ;;  %v3504_v26 = vadd.f32 %v3503_v10, %v3459_v31 }
 0x4ae   :  { %v3582_v0 = vadd.f32 %v3581_v52, %v3531_v7  ;;  %v3548_v25 = vpop.f32.mrf.mxu1 }
 0x4af   :  { %v3549_v58 = vadd.f32 %v3548_v25, %v3504_v26 }
 0x4b2   :  { %v3618_v18 = vpop.f32.mrf.mxu3 }
 0x4b3   :  { %v3619_v55 = vadd.f32 %v3618_v18, %v3582_v0 }
 0x4b5   :  { %3819 = vst [vmem:[%s5110_s6 + $0x48] sm:$0xff] %v3619_v55  ;;  %v3659_v13 = vsub.f32 %v3619_v55, %v4742_v57  ;;  %v3585_v6 = vpop.f32.mrf.mxu2 }
 0x4b6   :  { %v3586_v14 = vadd.f32 %v3585_v6, %v3537_v8 }
 0x4b7   :  { %v3667_v38 = vmul.f32 %v3659_v13, %v3659_v13 }
 0x4b9   :  { %v3674_v30 = vadd.f32 %v3667_v38, %v3666_v48 }
 0x4ba   :  { %v3622_v46 = vpop.f32.mrf.mxu3 }
 0x4bb   :  { %v3623_v32 = vadd.f32 %v3622_v46, %v3586_v14  ;;  %3675 = vadd.xlane.f32.xlu1 %v3674_v30 }
 0x4bd   :  { %3821 = vst [vmem:[%s5110_s6 + $0x58] sm:$0xff] %v3623_v32  ;;  %v3661_v57 = vsub.f32 %v3623_v32, %v4738_v39  ;;  %v3589_v36 = vpop.f32.mrf.mxu2 }
 0x4be   :  { %v3590_v22 = vadd.f32 %v3589_v36, %v3543_v45 }
 0x4bf   :  { %v3669_v9 = vmul.f32 %v3661_v57, %v3661_v57 }
 0x4c1   :  { %v3677_v29 = vadd.f32 %v3669_v9, %v3668_v2 }
 0x4c2   :  { %v3626_v37 = vpop.f32.mrf.mxu3 }
 0x4c3   :  { %v3627_v20 = vadd.f32 %v3626_v37, %v3590_v22  ;;  %3678 = vadd.xlane.f32.xlu2 %v3677_v29 }
 0x4c5   :  { %3823 = vst [vmem:[%s5110_s6 + $0x68] sm:$0xff] %v3627_v20  ;;  %v3663_v39 = vsub.f32 %v3627_v20, %v4736_v23  ;;  %v3593_v3 = vpop.f32.mrf.mxu2 }
 0x4c6   :  { %v3594_v16 = vadd.f32 %v3593_v3, %v3549_v58 }
 0x4c7   :  { %v3671_v41 = vmul.f32 %v3663_v39, %v3663_v39 }
 0x4c9   :  { %v3680_v49 = vadd.f32 %v3671_v41, %v3670_v54 }
 0x4ca   :  { %v3630_v28 = vpop.f32.mrf.mxu3 }
 0x4cb   :  { %v3631_v47 = vadd.f32 %v3630_v28, %v3594_v16  ;;  %3681 = vadd.xlane.f32.xlu0 %v3680_v49 }
 0x4cd   :  { %3825 = vst [vmem:[%s5110_s6 + $0x78] sm:$0xff] %v3631_v47  ;;  %v3665_v62 = vsub.f32 %v3631_v47, %v4746_v4 }
 0x4cf   :  { %v3673_v23 = vmul.f32 %v3665_v62, %v3665_v62 }
 0x4d1   :  { %v3683_v19 = vadd.f32 %v3673_v23, %v3672_v53 }
 0x4d3   :  { %3684 = vadd.xlane.f32.xlu1 %v3683_v19 }
 0x52e   :  { %v3676_v56 = vpop.xlane.xlu1 %3675 }
 0x52f   :  { %v3686_v59 = vadd.f32 %v3676_v56, %v5028_v43 }
 0x531   :  { %3695 = vst.msk [vmem:[%s5112_s8] sm:$0xff] %vm3690_vm1, %v3686_v59 }
 0x536   :  { %v3679_v40 = vpop.xlane.xlu2 %3678 }
 0x537   :  { %v3687_v61 = vadd.f32 %v3679_v40, %v5026_v15 }
 0x539   :  { %3696 = vst.msk [vmem:[%s5112_s8 + $0x8] sm:$0xff] %vm3690_vm1, %v3687_v61 }
 0x53e   :  { %v3682_v4 = vpop.xlane.xlu0 %3681 }
 0x53f   :  { %v3688_v52 = vadd.f32 %v3682_v4, %v5024_v50 }
 0x541   :  { %3697 = vst.msk [vmem:[%s5112_s8 + $0x10] sm:$0xff] %vm3690_vm1, %v3688_v52 }
 0x546   :  { %v3685_v43 = vpop.xlane.xlu1 %3684 }
 0x547   :  { %v3689_v34 = vadd.f32 %v3685_v43, %v5038_v63 }
 0x549   :  { %3698 = vst.msk [vmem:[%s5112_s8 + $0x18] sm:$0xff] %vm3690_vm1, %v3689_v34 }

</bundles_post_ra>
